<compile_context>
chip_gen: v7x
topology: tpu7x:2x2x1
jax: 0.10.0
libtpu: 0.0.40
codegen_flags: <defaults>
</compile_context>

<pallas_src>
import jax
import jax.numpy as jnp
import numpy as np
from jax.experimental import pallas as pl
from jax.experimental.pallas import tpu as pltpu


def _round_up(x, m):
    return ((x + m - 1) // m) * m


def gru_kernel(x_ref, h0_ref, wih_ref, whh_ref, bih_ref, bhh_ref,
               out_ref, hN_ref):
    """One grid step = one chunk of T_CHUNK timesteps.

    x_ref   : (T_chunk * B_pad, H_in_pad)  embedded inputs for this chunk
    h0_ref  : (B_pad, H_pad)               initial hidden state
    wih_ref : (H_in_pad, 3 * H_pad)        gate-concatenated input weights (r|z|n)
    whh_ref : (H_pad, 3 * H_pad)           gate-concatenated hidden weights (r|z|n)
    bih_ref : (1, 3 * H_pad)
    bhh_ref : (1, 3 * H_pad)
    out_ref : (T_chunk, B_pad, H_pad)      GRU outputs for this chunk
    hN_ref  : (B_pad, H_pad)               final hidden; VMEM-resident carry
    """
    t = pl.program_id(0)
    t_chunk, b, h_dim = out_ref.shape

    @pl.when(t == 0)
    def _():
        hN_ref[...] = h0_ref[...]

    # Hoisted, time-parallel input projection: one big lane-dense MXU matmul
    # per chunk covering all T_chunk timesteps and all three gates.
    gi_all = (jnp.dot(x_ref[...], wih_ref[...],
                      preferred_element_type=jnp.float32)
              + bih_ref[...])                              # (T_chunk*B, 3H)

    whh = whh_ref[...]
    bhh = bhh_ref[...]
    h = hN_ref[...]                                        # carry in registers

    # Statically-unrolled recurrence over the chunk (T_chunk is small & fixed,
    # equivalent to lax.fori_loop(..., unroll=True) but with tile-aligned
    # static slices).  Only the h-side matmul remains inside the loop.
    for i in range(t_chunk):
        gi = gi_all[i * b:(i + 1) * b, :]                  # (B, 3H)
        gh = jnp.dot(h, whh, preferred_element_type=jnp.float32) + bhh
        r = jax.nn.sigmoid(gi[:, 0:h_dim] + gh[:, 0:h_dim])
        z = jax.nn.sigmoid(gi[:, h_dim:2 * h_dim] + gh[:, h_dim:2 * h_dim])
        n = jnp.tanh(gi[:, 2 * h_dim:3 * h_dim] + r * gh[:, 2 * h_dim:3 * h_dim])
        h = (1.0 - z) * n + z * h
        out_ref[i] = h.astype(out_ref.dtype)

    hN_ref[...] = h


def encoder_forward(tokens, h0, emb_table, w_ih, w_hh, b_ih, b_hh, *, t_chunk=4):
    """tokens: (S, B) int32 time-major; h0: (1, B, H_out).

    Weights use the gate-stacked layout (3, K, H_out), gate order (r, z, n),
    matching torch.nn.GRU semantics.  Returns (output (S, B, H_out),
    hN (1, B, H_out)).
    """
    S, B = tokens.shape
    V, H_in = emb_table.shape
    H_out = w_hh.shape[-1]
    if S % t_chunk != 0:
        t_chunk = 1
    n_chunks = S // t_chunk

    # Sublane/lane-aligned padded sizes.  Zero padding is exact for the GRU:
    # padded hidden lanes / batch rows never contaminate real ones.
    B_pad = _round_up(B, 8)
    H_in_pad = _round_up(H_in, 128)
    H_pad = _round_up(H_out, 128)

    # --- XLA glue: embedding lookup as a real gather (no one-hot). ---
    x = emb_table[tokens]                                            # (S, B, H_in)
    x = jnp.pad(x, ((0, 0), (0, B_pad - B), (0, H_in_pad - H_in)))
    x_flat = x.reshape(S * B_pad, H_in_pad)

    # Gate-concatenated (r|z|n), zero-padded weights / biases.
    def cat_gates(w, rows_pad):
        rows = w.shape[1]
        w = jnp.pad(w, ((0, 0), (0, rows_pad - rows), (0, H_pad - H_out)))
        return jnp.concatenate([w[0], w[1], w[2]], axis=-1)          # (rows_pad, 3*H_pad)

    w_ih_c = cat_gates(w_ih, H_in_pad)                               # (H_in_pad, 3*H_pad)
    w_hh_c = cat_gates(w_hh, H_pad)                                  # (H_pad, 3*H_pad)
    b_ih_c = cat_gates(b_ih, 1)                                      # (1, 3*H_pad)
    b_hh_c = cat_gates(b_hh, 1)                                      # (1, 3*H_pad)

    h0_p = jnp.pad(h0.reshape(B, H_out),
                   ((0, B_pad - B), (0, H_pad - H_out)))             # (B_pad, H_pad)

    out_pad, hN_pad = pl.pallas_call(
        gru_kernel,
        out_shape=(jax.ShapeDtypeStruct((S, B_pad, H_pad), jnp.float32),
                   jax.ShapeDtypeStruct((B_pad, H_pad), jnp.float32)),
        grid_spec=pltpu.PrefetchScalarGridSpec(
            num_scalar_prefetch=0,
            grid=(n_chunks,),
            in_specs=[
                pl.BlockSpec((t_chunk * B_pad, H_in_pad), lambda t: (t, 0)),
                pl.BlockSpec((B_pad, H_pad), lambda t: (0, 0)),
                pl.BlockSpec((H_in_pad, 3 * H_pad), lambda t: (0, 0)),
                pl.BlockSpec((H_pad, 3 * H_pad), lambda t: (0, 0)),
                pl.BlockSpec((1, 3 * H_pad), lambda t: (0, 0)),
                pl.BlockSpec((1, 3 * H_pad), lambda t: (0, 0)),
            ],
            out_specs=[
                pl.BlockSpec((t_chunk, B_pad, H_pad), lambda t: (t, 0, 0)),
                pl.BlockSpec((B_pad, H_pad), lambda t: (0, 0)),      # resident carry
            ],
        ),
        compiler_params=pltpu.CompilerParams(
            dimension_semantics=("arbitrary",)),                     # sequential recurrence
    )(x_flat, h0_p, w_ih_c, w_hh_c, b_ih_c, b_hh_c)

    out = out_pad[:, :B, :H_out]
    hN = hN_pad[:B, :H_out].reshape(1, B, H_out)
    return out, hN


def ref_forward(tokens, h0, emb_table, w_ih, w_hh, b_ih, b_hh):
    """Pure-JAX reference matching torch.nn.Embedding + torch.nn.GRU."""
    x_seq = emb_table[tokens]                                        # (S, B, H_in)

    def step(h, x_t):
        gi = jnp.einsum('bi,gio->gbo', x_t, w_ih) + b_ih             # (3, B, H_out)
        gh = jnp.einsum('bh,gho->gbo', h, w_hh) + b_hh
        r = jax.nn.sigmoid(gi[0] + gh[0])
        z = jax.nn.sigmoid(gi[1] + gh[1])
        n = jnp.tanh(gi[2] + r * gh[2])
        h_new = (1.0 - z) * n + z * h
        return h_new, h_new

    hN, outs = jax.lax.scan(step, h0[0], x_seq)
    return outs, hN[None]


if __name__ == "__main__":
    # Encoder(input_size=V, hidden_size=H_in, output_size=H_out)
    V = 16        # vocab (nn.Embedding rows)
    H_in = 32     # embedding dim / GRU input size
    H_out = 32    # GRU hidden size
    S, B = 8, 2   # seq len (time-major), batch

    key = jax.random.PRNGKey(0)
    k_tok, k_emb, k_wih, k_whh, k_bih, k_bhh = jax.random.split(key, 6)

    tokens = jax.random.randint(k_tok, (S, B), 0, V, dtype=jnp.int32)
    h0 = jnp.zeros((1, B, H_out), dtype=jnp.float32)     # Encoder.initHidden analogue

    scale = 1.0 / np.sqrt(H_out)
    emb_table = jax.random.normal(k_emb, (V, H_in), dtype=jnp.float32) * 0.1
    # Gate-stacked (3, K, H_out) layout, gate order (r, z, n) — transposed view
    # of PyTorch's (3*H_out, K) weight_ih_l0 / weight_hh_l0.
    w_ih = jax.random.uniform(k_wih, (3, H_in, H_out), jnp.float32, -scale, scale)
    w_hh = jax.random.uniform(k_whh, (3, H_out, H_out), jnp.float32, -scale, scale)
    b_ih = jax.random.uniform(k_bih, (3, 1, H_out), jnp.float32, -scale, scale)
    b_hh = jax.random.uniform(k_bhh, (3, 1, H_out), jnp.float32, -scale, scale)

    out, hN = encoder_forward(tokens, h0, emb_table, w_ih, w_hh, b_ih, b_hh,
                              t_chunk=4)
    out, hN = jax.block_until_ready((out, hN))

    out_ref, hN_ref = ref_forward(tokens, h0, emb_table, w_ih, w_hh, b_ih, b_hh)
    np.testing.assert_allclose(np.asarray(out), np.asarray(out_ref),
                               rtol=1e-4, atol=1e-4)
    np.testing.assert_allclose(np.asarray(hN), np.asarray(hN_ref),
                               rtol=1e-4, atol=1e-4)

    print("KERNEL_OK")
</pallas_src>

<mosaic_0001>
module attributes {stable_mosaic.version = 11 : i64} {
  func.func @gru_kernel(%arg0: i32, %arg1: memref<32x128xf32, #tpu.memory_space<vmem>>, %arg2: memref<8x128xf32, #tpu.memory_space<vmem>>, %arg3: memref<128x384xf32, #tpu.memory_space<vmem>>, %arg4: memref<128x384xf32, #tpu.memory_space<vmem>>, %arg5: memref<1x384xf32, #tpu.memory_space<vmem>>, %arg6: memref<1x384xf32, #tpu.memory_space<vmem>>, %arg7: memref<4x8x128xf32, #tpu.memory_space<vmem>>, %arg8: memref<8x128xf32, #tpu.memory_space<vmem>>) attributes {dimension_semantics = [#tpu.dimension_semantics<arbitrary>], iteration_bounds = array<i64: 2>, scalar_prefetch = 0 : i64, scratch_operands = 0 : i64, tpu.core_type = #tpu.core_type<tc>, window_params = [{transform_indices = @transform_0, window_bounds = array<i64: 32, 128>}, {pipeline_mode = #tpu.pipeline_mode<synchronous>, transform_indices = @transform_1, window_bounds = array<i64: 8, 128>}, {pipeline_mode = #tpu.pipeline_mode<synchronous>, transform_indices = @transform_2, window_bounds = array<i64: 128, 384>}, {pipeline_mode = #tpu.pipeline_mode<synchronous>, transform_indices = @transform_3, window_bounds = array<i64: 128, 384>}, {pipeline_mode = #tpu.pipeline_mode<synchronous>, transform_indices = @transform_4, window_bounds = array<i64: 1, 384>}, {pipeline_mode = #tpu.pipeline_mode<synchronous>, transform_indices = @transform_5, window_bounds = array<i64: 1, 384>}, {transform_indices = @transform_6, window_bounds = array<i64: 4, 8, 128>}, {pipeline_mode = #tpu.pipeline_mode<synchronous>, transform_indices = @transform_7, window_bounds = array<i64: 8, 128>}]} {
    %c0_i32 = arith.constant 0 : i32
    %0 = arith.cmpi eq, %arg0, %c0_i32 : i32
    %1 = arith.extui %0 : i1 to i32
    %c0_i32_0 = arith.constant 0 : i32
    %2 = arith.cmpi ne, %1, %c0_i32_0 : i32
    scf.if %2 {
      %c0_39 = arith.constant 0 : index
      %c0_40 = arith.constant 0 : index
      %145 = vector.load %arg2[%c0_39, %c0_40] : memref<8x128xf32, #tpu.memory_space<vmem>>, vector<8x128xf32>
      %c0_41 = arith.constant 0 : index
      %c0_42 = arith.constant 0 : index
      %146 = vector.load %arg8[%c0_41, %c0_42] : memref<8x128xf32, #tpu.memory_space<vmem>>, vector<8x128xf32>
      tpu.vector_store %arg8[%c0_41, %c0_42], %145 {strides = array<i32>} : memref<8x128xf32, #tpu.memory_space<vmem>>, vector<8x128xf32>,
    } else {
    }
    %c0 = arith.constant 0 : index
    %c0_1 = arith.constant 0 : index
    %3 = vector.load %arg1[%c0, %c0_1] : memref<32x128xf32, #tpu.memory_space<vmem>>, vector<32x128xf32>
    %c0_2 = arith.constant 0 : index
    %c0_3 = arith.constant 0 : index
    %4 = vector.load %arg3[%c0_2, %c0_3] : memref<128x384xf32, #tpu.memory_space<vmem>>, vector<128x384xf32>
    %cst = arith.constant dense<0.000000e+00> : vector<32x384xf32>
    %5 = tpu.matmul %3, %4, %cst {dimension_numbers = #tpu.dot_dimension_numbers<[1], [0], [0], [1], [0, 0, 1, 1], [], []>} : vector<32x128xf32>, vector<128x384xf32>, vector<32x384xf32> -> vector<32x384xf32>
    %c0_4 = arith.constant 0 : index
    %c0_5 = arith.constant 0 : index
    %6 = vector.load %arg5[%c0_4, %c0_5] : memref<1x384xf32, #tpu.memory_space<vmem>>, vector<1x384xf32>
    %7 = vector.broadcast %6 : vector<1x384xf32> to vector<32x384xf32>
    %8 = arith.addf %5, %7 : vector<32x384xf32>
    %c0_6 = arith.constant 0 : index
    %c0_7 = arith.constant 0 : index
    %9 = vector.load %arg4[%c0_6, %c0_7] : memref<128x384xf32, #tpu.memory_space<vmem>>, vector<128x384xf32>
    %c0_8 = arith.constant 0 : index
    %c0_9 = arith.constant 0 : index
    %10 = vector.load %arg6[%c0_8, %c0_9] : memref<1x384xf32, #tpu.memory_space<vmem>>, vector<1x384xf32>
    %c0_10 = arith.constant 0 : index
    %c0_11 = arith.constant 0 : index
    %11 = vector.load %arg8[%c0_10, %c0_11] : memref<8x128xf32, #tpu.memory_space<vmem>>, vector<8x128xf32>
    %12 = vector.extract_strided_slice %8 {offsets = [0, 0], sizes = [8, 384], strides = [1, 1]} : vector<32x384xf32> to vector<8x384xf32>
    %cst_12 = arith.constant dense<0.000000e+00> : vector<8x384xf32>
    %13 = tpu.matmul %11, %9, %cst_12 {dimension_numbers = #tpu.dot_dimension_numbers<[1], [0], [0], [1], [0, 0, 1, 1], [], []>} : vector<8x128xf32>, vector<128x384xf32>, vector<8x384xf32> -> vector<8x384xf32>
    %14 = vector.broadcast %10 : vector<1x384xf32> to vector<8x384xf32>
    %15 = arith.addf %13, %14 : vector<8x384xf32>
    %16 = vector.extract_strided_slice %12 {offsets = [0, 0], sizes = [8, 128], strides = [1, 1]} : vector<8x384xf32> to vector<8x128xf32>
    %17 = vector.extract_strided_slice %15 {offsets = [0, 0], sizes = [8, 128], strides = [1, 1]} : vector<8x384xf32> to vector<8x128xf32>
    %18 = arith.addf %16, %17 : vector<8x128xf32>
    %19 = arith.negf %18 : vector<8x128xf32>
    %20 = math.exp %19 : vector<8x128xf32>
    %cst_13 = arith.constant 1.000000e+00 : f32
    %21 = vector.broadcast %cst_13 : f32 to vector<8x128xf32>
    %22 = arith.addf %21, %20 : vector<8x128xf32>
    %23 = arith.divf %21, %22 : vector<8x128xf32>
    %24 = vector.extract_strided_slice %12 {offsets = [0, 128], sizes = [8, 128], strides = [1, 1]} : vector<8x384xf32> to vector<8x128xf32>
    %25 = vector.extract_strided_slice %15 {offsets = [0, 128], sizes = [8, 128], strides = [1, 1]} : vector<8x384xf32> to vector<8x128xf32>
    %26 = arith.addf %24, %25 : vector<8x128xf32>
    %27 = arith.negf %26 : vector<8x128xf32>
    %28 = math.exp %27 : vector<8x128xf32>
    %cst_14 = arith.constant 1.000000e+00 : f32
    %29 = vector.broadcast %cst_14 : f32 to vector<8x128xf32>
    %30 = arith.addf %29, %28 : vector<8x128xf32>
    %31 = arith.divf %29, %30 : vector<8x128xf32>
    %32 = vector.extract_strided_slice %12 {offsets = [0, 256], sizes = [8, 128], strides = [1, 1]} : vector<8x384xf32> to vector<8x128xf32>
    %33 = vector.extract_strided_slice %15 {offsets = [0, 256], sizes = [8, 128], strides = [1, 1]} : vector<8x384xf32> to vector<8x128xf32>
    %34 = arith.mulf %23, %33 : vector<8x128xf32>
    %35 = arith.addf %32, %34 : vector<8x128xf32>
    %36 = math.tanh %35 : vector<8x128xf32>
    %cst_15 = arith.constant 1.000000e+00 : f32
    %37 = vector.broadcast %cst_15 : f32 to vector<8x128xf32>
    %38 = arith.subf %37, %31 : vector<8x128xf32>
    %39 = arith.mulf %38, %36 : vector<8x128xf32>
    %40 = arith.mulf %31, %11 : vector<8x128xf32>
    %41 = arith.addf %39, %40 : vector<8x128xf32>
    %c0_16 = arith.constant 0 : index
    %c0_17 = arith.constant 0 : index
    %c0_18 = arith.constant 0 : index
    %42 = vector.load %arg7[%c0_16, %c0_17, %c0_18] : memref<4x8x128xf32, #tpu.memory_space<vmem>>, vector<1x8x128xf32>
    %43 = vector.shape_cast %42 : vector<1x8x128xf32> to vector<8x128xf32>
    %44 = vector.shape_cast %41 : vector<8x128xf32> to vector<1x8x128xf32>
    tpu.vector_store %arg7[%c0_16, %c0_17, %c0_18], %44 {strides = array<i32>} : memref<4x8x128xf32, #tpu.memory_space<vmem>>, vector<1x8x128xf32>,
    %45 = vector.extract_strided_slice %8 {offsets = [8, 0], sizes = [8, 384], strides = [1, 1]} : vector<32x384xf32> to vector<8x384xf32>
    %cst_19 = arith.constant dense<0.000000e+00> : vector<8x384xf32>
    %46 = tpu.matmul %41, %9, %cst_19 {dimension_numbers = #tpu.dot_dimension_numbers<[1], [0], [0], [1], [0, 0, 1, 1], [], []>} : vector<8x128xf32>, vector<128x384xf32>, vector<8x384xf32> -> vector<8x384xf32>
    %47 = vector.broadcast %10 : vector<1x384xf32> to vector<8x384xf32>
    %48 = arith.addf %46, %47 : vector<8x384xf32>
    %49 = vector.extract_strided_slice %45 {offsets = [0, 0], sizes = [8, 128], strides = [1, 1]} : vector<8x384xf32> to vector<8x128xf32>
    %50 = vector.extract_strided_slice %48 {offsets = [0, 0], sizes = [8, 128], strides = [1, 1]} : vector<8x384xf32> to vector<8x128xf32>
    %51 = arith.addf %49, %50 : vector<8x128xf32>
    %52 = arith.negf %51 : vector<8x128xf32>
    %53 = math.exp %52 : vector<8x128xf32>
    %cst_20 = arith.constant 1.000000e+00 : f32
    %54 = vector.broadcast %cst_20 : f32 to vector<8x128xf32>
    %55 = arith.addf %54, %53 : vector<8x128xf32>
    %56 = arith.divf %54, %55 : vector<8x128xf32>
    %57 = vector.extract_strided_slice %45 {offsets = [0, 128], sizes = [8, 128], strides = [1, 1]} : vector<8x384xf32> to vector<8x128xf32>
    %58 = vector.extract_strided_slice %48 {offsets = [0, 128], sizes = [8, 128], strides = [1, 1]} : vector<8x384xf32> to vector<8x128xf32>
    %59 = arith.addf %57, %58 : vector<8x128xf32>
    %60 = arith.negf %59 : vector<8x128xf32>
    %61 = math.exp %60 : vector<8x128xf32>
    %cst_21 = arith.constant 1.000000e+00 : f32
    %62 = vector.broadcast %cst_21 : f32 to vector<8x128xf32>
    %63 = arith.addf %62, %61 : vector<8x128xf32>
    %64 = arith.divf %62, %63 : vector<8x128xf32>
    %65 = vector.extract_strided_slice %45 {offsets = [0, 256], sizes = [8, 128], strides = [1, 1]} : vector<8x384xf32> to vector<8x128xf32>
    %66 = vector.extract_strided_slice %48 {offsets = [0, 256], sizes = [8, 128], strides = [1, 1]} : vector<8x384xf32> to vector<8x128xf32>
    %67 = arith.mulf %56, %66 : vector<8x128xf32>
    %68 = arith.addf %65, %67 : vector<8x128xf32>
    %69 = math.tanh %68 : vector<8x128xf32>
    %cst_22 = arith.constant 1.000000e+00 : f32
    %70 = vector.broadcast %cst_22 : f32 to vector<8x128xf32>
    %71 = arith.subf %70, %64 : vector<8x128xf32>
    %72 = arith.mulf %71, %69 : vector<8x128xf32>
    %73 = arith.mulf %64, %41 : vector<8x128xf32>
    %74 = arith.addf %72, %73 : vector<8x128xf32>
    %c1 = arith.constant 1 : index
    %c0_23 = arith.constant 0 : index
    %c0_24 = arith.constant 0 : index
    %75 = vector.load %arg7[%c1, %c0_23, %c0_24] : memref<4x8x128xf32, #tpu.memory_space<vmem>>, vector<1x8x128xf32>
    %76 = vector.shape_cast %75 : vector<1x8x128xf32> to vector<8x128xf32>
    %77 = vector.shape_cast %74 : vector<8x128xf32> to vector<1x8x128xf32>
    tpu.vector_store %arg7[%c1, %c0_23, %c0_24], %77 {strides = array<i32>} : memref<4x8x128xf32, #tpu.memory_space<vmem>>, vector<1x8x128xf32>,
    %78 = vector.extract_strided_slice %8 {offsets = [16, 0], sizes = [8, 384], strides = [1, 1]} : vector<32x384xf32> to vector<8x384xf32>
    %cst_25 = arith.constant dense<0.000000e+00> : vector<8x384xf32>
    %79 = tpu.matmul %74, %9, %cst_25 {dimension_numbers = #tpu.dot_dimension_numbers<[1], [0], [0], [1], [0, 0, 1, 1], [], []>} : vector<8x128xf32>, vector<128x384xf32>, vector<8x384xf32> -> vector<8x384xf32>
    %80 = vector.broadcast %10 : vector<1x384xf32> to vector<8x384xf32>
    %81 = arith.addf %79, %80 : vector<8x384xf32>
    %82 = vector.extract_strided_slice %78 {offsets = [0, 0], sizes = [8, 128], strides = [1, 1]} : vector<8x384xf32> to vector<8x128xf32>
    %83 = vector.extract_strided_slice %81 {offsets = [0, 0], sizes = [8, 128], strides = [1, 1]} : vector<8x384xf32> to vector<8x128xf32>
    %84 = arith.addf %82, %83 : vector<8x128xf32>
    %85 = arith.negf %84 : vector<8x128xf32>
    %86 = math.exp %85 : vector<8x128xf32>
    %cst_26 = arith.constant 1.000000e+00 : f32
    %87 = vector.broadcast %cst_26 : f32 to vector<8x128xf32>
    %88 = arith.addf %87, %86 : vector<8x128xf32>
    %89 = arith.divf %87, %88 : vector<8x128xf32>
    %90 = vector.extract_strided_slice %78 {offsets = [0, 128], sizes = [8, 128], strides = [1, 1]} : vector<8x384xf32> to vector<8x128xf32>
    %91 = vector.extract_strided_slice %81 {offsets = [0, 128], sizes = [8, 128], strides = [1, 1]} : vector<8x384xf32> to vector<8x128xf32>
    %92 = arith.addf %90, %91 : vector<8x128xf32>
    %93 = arith.negf %92 : vector<8x128xf32>
    %94 = math.exp %93 : vector<8x128xf32>
    %cst_27 = arith.constant 1.000000e+00 : f32
    %95 = vector.broadcast %cst_27 : f32 to vector<8x128xf32>
    %96 = arith.addf %95, %94 : vector<8x128xf32>
    %97 = arith.divf %95, %96 : vector<8x128xf32>
    %98 = vector.extract_strided_slice %78 {offsets = [0, 256], sizes = [8, 128], strides = [1, 1]} : vector<8x384xf32> to vector<8x128xf32>
    %99 = vector.extract_strided_slice %81 {offsets = [0, 256], sizes = [8, 128], strides = [1, 1]} : vector<8x384xf32> to vector<8x128xf32>
    %100 = arith.mulf %89, %99 : vector<8x128xf32>
    %101 = arith.addf %98, %100 : vector<8x128xf32>
    %102 = math.tanh %101 : vector<8x128xf32>
    %cst_28 = arith.constant 1.000000e+00 : f32
    %103 = vector.broadcast %cst_28 : f32 to vector<8x128xf32>
    %104 = arith.subf %103, %97 : vector<8x128xf32>
    %105 = arith.mulf %104, %102 : vector<8x128xf32>
    %106 = arith.mulf %97, %74 : vector<8x128xf32>
    %107 = arith.addf %105, %106 : vector<8x128xf32>
    %c2 = arith.constant 2 : index
    %c0_29 = arith.constant 0 : index
    %c0_30 = arith.constant 0 : index
    %108 = vector.load %arg7[%c2, %c0_29, %c0_30] : memref<4x8x128xf32, #tpu.memory_space<vmem>>, vector<1x8x128xf32>
    %109 = vector.shape_cast %108 : vector<1x8x128xf32> to vector<8x128xf32>
    %110 = vector.shape_cast %107 : vector<8x128xf32> to vector<1x8x128xf32>
    tpu.vector_store %arg7[%c2, %c0_29, %c0_30], %110 {strides = array<i32>} : memref<4x8x128xf32, #tpu.memory_space<vmem>>, vector<1x8x128xf32>,
    %111 = vector.extract_strided_slice %8 {offsets = [24, 0], sizes = [8, 384], strides = [1, 1]} : vector<32x384xf32> to vector<8x384xf32>
    %cst_31 = arith.constant dense<0.000000e+00> : vector<8x384xf32>
    %112 = tpu.matmul %107, %9, %cst_31 {dimension_numbers = #tpu.dot_dimension_numbers<[1], [0], [0], [1], [0, 0, 1, 1], [], []>} : vector<8x128xf32>, vector<128x384xf32>, vector<8x384xf32> -> vector<8x384xf32>
    %113 = vector.broadcast %10 : vector<1x384xf32> to vector<8x384xf32>
    %114 = arith.addf %112, %113 : vector<8x384xf32>
    %115 = vector.extract_strided_slice %111 {offsets = [0, 0], sizes = [8, 128], strides = [1, 1]} : vector<8x384xf32> to vector<8x128xf32>
    %116 = vector.extract_strided_slice %114 {offsets = [0, 0], sizes = [8, 128], strides = [1, 1]} : vector<8x384xf32> to vector<8x128xf32>
    %117 = arith.addf %115, %116 : vector<8x128xf32>
    %118 = arith.negf %117 : vector<8x128xf32>
    %119 = math.exp %118 : vector<8x128xf32>
    %cst_32 = arith.constant 1.000000e+00 : f32
    %120 = vector.broadcast %cst_32 : f32 to vector<8x128xf32>
    %121 = arith.addf %120, %119 : vector<8x128xf32>
    %122 = arith.divf %120, %121 : vector<8x128xf32>
    %123 = vector.extract_strided_slice %111 {offsets = [0, 128], sizes = [8, 128], strides = [1, 1]} : vector<8x384xf32> to vector<8x128xf32>
    %124 = vector.extract_strided_slice %114 {offsets = [0, 128], sizes = [8, 128], strides = [1, 1]} : vector<8x384xf32> to vector<8x128xf32>
    %125 = arith.addf %123, %124 : vector<8x128xf32>
    %126 = arith.negf %125 : vector<8x128xf32>
    %127 = math.exp %126 : vector<8x128xf32>
    %cst_33 = arith.constant 1.000000e+00 : f32
    %128 = vector.broadcast %cst_33 : f32 to vector<8x128xf32>
    %129 = arith.addf %128, %127 : vector<8x128xf32>
    %130 = arith.divf %128, %129 : vector<8x128xf32>
    %131 = vector.extract_strided_slice %111 {offsets = [0, 256], sizes = [8, 128], strides = [1, 1]} : vector<8x384xf32> to vector<8x128xf32>
    %132 = vector.extract_strided_slice %114 {offsets = [0, 256], sizes = [8, 128], strides = [1, 1]} : vector<8x384xf32> to vector<8x128xf32>
    %133 = arith.mulf %122, %132 : vector<8x128xf32>
    %134 = arith.addf %131, %133 : vector<8x128xf32>
    %135 = math.tanh %134 : vector<8x128xf32>
    %cst_34 = arith.constant 1.000000e+00 : f32
    %136 = vector.broadcast %cst_34 : f32 to vector<8x128xf32>
    %137 = arith.subf %136, %130 : vector<8x128xf32>
    %138 = arith.mulf %137, %135 : vector<8x128xf32>
    %139 = arith.mulf %130, %107 : vector<8x128xf32>
    %140 = arith.addf %138, %139 : vector<8x128xf32>
    %c3 = arith.constant 3 : index
    %c0_35 = arith.constant 0 : index
    %c0_36 = arith.constant 0 : index
    %141 = vector.load %arg7[%c3, %c0_35, %c0_36] : memref<4x8x128xf32, #tpu.memory_space<vmem>>, vector<1x8x128xf32>
    %142 = vector.shape_cast %141 : vector<1x8x128xf32> to vector<8x128xf32>
    %143 = vector.shape_cast %140 : vector<8x128xf32> to vector<1x8x128xf32>
    tpu.vector_store %arg7[%c3, %c0_35, %c0_36], %143 {strides = array<i32>} : memref<4x8x128xf32, #tpu.memory_space<vmem>>, vector<1x8x128xf32>,
    %c0_37 = arith.constant 0 : index
    %c0_38 = arith.constant 0 : index
    %144 = vector.load %arg8[%c0_37, %c0_38] : memref<8x128xf32, #tpu.memory_space<vmem>>, vector<8x128xf32>
    tpu.vector_store %arg8[%c0_37, %c0_38], %140 {strides = array<i32>} : memref<8x128xf32, #tpu.memory_space<vmem>>, vector<8x128xf32>,
    return
  }
  func.func @transform_0(%arg0: i32) -> (i32, i32) {
    %c0_i32 = arith.constant 0 : i32
    %c0_i32_0 = arith.constant 0 : i32
    return %arg0, %c0_i32 : i32, i32
  }
  func.func @transform_1(%arg0: i32) -> (i32, i32) {
    %c0_i32 = arith.constant 0 : i32
    %c0_i32_0 = arith.constant 0 : i32
    %c0_i32_1 = arith.constant 0 : i32
    return %c0_i32, %c0_i32_0 : i32, i32
  }
  func.func @transform_2(%arg0: i32) -> (i32, i32) {
    %c0_i32 = arith.constant 0 : i32
    %c0_i32_0 = arith.constant 0 : i32
    %c0_i32_1 = arith.constant 0 : i32
    return %c0_i32, %c0_i32_0 : i32, i32
  }
  func.func @transform_3(%arg0: i32) -> (i32, i32) {
    %c0_i32 = arith.constant 0 : i32
    %c0_i32_0 = arith.constant 0 : i32
    %c0_i32_1 = arith.constant 0 : i32
    return %c0_i32, %c0_i32_0 : i32, i32
  }
  func.func @transform_4(%arg0: i32) -> (i32, i32) {
    %c0_i32 = arith.constant 0 : i32
    %c0_i32_0 = arith.constant 0 : i32
    %c0_i32_1 = arith.constant 0 : i32
    return %c0_i32, %c0_i32_0 : i32, i32
  }
  func.func @transform_5(%arg0: i32) -> (i32, i32) {
    %c0_i32 = arith.constant 0 : i32
    %c0_i32_0 = arith.constant 0 : i32
    %c0_i32_1 = arith.constant 0 : i32
    return %c0_i32, %c0_i32_0 : i32, i32
  }
  func.func @transform_6(%arg0: i32) -> (i32, i32, i32) {
    %c0_i32 = arith.constant 0 : i32
    %c0_i32_0 = arith.constant 0 : i32
    %c0_i32_1 = arith.constant 0 : i32
    return %arg0, %c0_i32, %c0_i32_0 : i32, i32, i32
  }
  func.func @transform_7(%arg0: i32) -> (i32, i32) {
    %c0_i32 = arith.constant 0 : i32
    %c0_i32_0 = arith.constant 0 : i32
    %c0_i32_1 = arith.constant 0 : i32
    return %c0_i32, %c0_i32_0 : i32, i32
  }
}

</mosaic_0001>

<bundles_post_ra>
// kernel: tpu_custom_call.1
= control target key start
LH: loop header
LB: loop body
LE: loop exit
PB: predicated region body
PF: predicated region fallthrough
CT: control target
= control target key end

     0   :  { %13 = vsyncpa [#allocation3], 0  ;;  %s3008_s0 = inlined_call_operand.hbm [shape: f32[64,128], index: 0, kind: input, shape index: {}]   ;;  %s3009_s1 = inlined_call_operand.hbm [shape: f32[8,128], index: 1, kind: input, shape index: {}]   ;;  %s3010_s2 = inlined_call_operand.hbm [shape: f32[128,384], index: 2, kind: input, shape index: {}]   ;;  %s3011_s3 = inlined_call_operand.hbm [shape: f32[128,384], index: 3, kind: input, shape index: {}]   ;;  %s3012_s4 = inlined_call_operand.vmem [shape: f32[1,384], index: 4, kind: input, shape index: {}]   ;;  %s3013_s5 = inlined_call_operand.vmem [shape: f32[1,384], index: 5, kind: input, shape index: {}]   ;;  %s3014_s6 = inlined_call_operand.hbm [shape: f32[8,8,128], index: 6, kind: output, shape index: {0}]   ;;  %s3015_s7 = inlined_call_operand.hbm [shape: f32[8,128], index: 7, kind: output, shape index: {1}]  }
   0x1   :  { %15 = vsyncpa [#allocation3 + $0x1], 0 }
   0x2   :  { %16 = vsyncpa [#allocation6], 0 }
   0x3   :  { %17 = vsyncpa [#allocation9], 0 }
   0x4   :  { %18 = vsyncpa [#allocation4], 0 }
   0x5   :  { %20 = vsyncpa [#allocation4 + $0x1], 0 }
   0x6   :  { %21 = vsyncpa [#allocation12], 0  ;;  %s2471_s24 = smov 0   ;;  %s2473_s25 = smov 0  }
   0x7   :  { %s2475_s26 = smov 0   ;;  %s2477_s27 = smov 0  }
   0x8 LB: > { %s2492_s28 = sadd.s32 4294967295, %s2414_s27   ;;  %s1449_s29 = sadd.s32 4294967294, %s2414_s27   ;;  %s2414_s27 = sphi %s2477_s27, %s3044_s27   ;;  %s2410_s26 = sphi %s2475_s26, %s3043_s26   ;;  %s2406_s25 = sphi %s2473_s25, %s3042_s25   ;;  %s2402_s24 = sphi %s2471_s24, %s3041_s24  }
   0x9   : > { %p47_p0 = scmp.ne.s32.totalorder %s2406_s25, %s2402_s24  ;;  %p3016_p1 = scmp.eq.s32.totalorder %s2492_s28, 0 }
   0xa   : > { %p182_p3 = scmp.eq.s32.totalorder %s1449_s29, 1  ;;  %p1450_p5 = scmp.ge.s32.totalorder %s2414_s27, 1 }
   0xb   : > { %p2501_p4 = por %p3016_p1, %p47_p0  ;;  %p210_p7 = scmp.lt.s32.totalorder %s2414_s27, 3 }
   0xc   : > { %p2506_p6 = por %p182_p3, %p47_p0  ;;  %s2416_s10 = smov [#allocation5]  }
   0xd   : > { %s3019_s30 = scalar_select %p2501_p4, 1, 0 }
   0xe   : > { %s3020_s8 = scalar_select %p2506_p6, 1, 0 }
   0xf   : > { %p2512_p9 = pnand %p1450_p5, %p210_p7  ;;  %s223_s11 = sshll.u32 %s2416_s10, 4  ;;  %s224_s11 = int_to_ptr.vmem [resolvable:$true] %s223_s11 }
  0x10   : > { %s2417_s12 = smov [#allocation7]   ;;  %s2418_s15 = smov [#allocation8]  }
  0x11   : > { %s3021_s9 = scalar_select %p2512_p9, 1, 0 }
  0x12   : > { %p2083_p11 = pneg %p2512_p9  ;;  %s233_s13 = sshll.u32 %s2417_s12, 4  ;;  %s2525_s13 = int_to_ptr.vmem [resolvable:$true] %s233_s13 }
  0x13   : > { %s2527_s16 = sshll.u32 %s2418_s15, 4  ;;  %s2196_s19 = scalar_lea.hbm %s3009_s1, 128  ;;  %s247_s16 = int_to_ptr.vmem [resolvable:$true] %s2527_s16 }
  0x14   : > { %p2521_p12 = pnand %p2083_p11, %p3016_p1  ;;  %p2197_p13 = scmp.ne.s32.totalorder %s3009_s1, %s2196_s19 }
  0x15   : > { %p2203_p7 = scmp.lt.u32.totalorder %s2196_s19, %s3009_s1 }
  0x16   : > { %p2537_p0 = pneg %p2521_p12 }
  0x18   : > { %p2199_p3 = pnand %p2537_p0, %p2197_p13 }
  0x1a   : > { %p2200_p5 = pneg %p2199_p3 }
  0x1c   : > { %p2205_p11 = pnand %p2203_p7, %p2200_p5 }
  0x1e   : > { %2208 = shalt.err (!%p2205_p11)
}
  0x1f   : > { %s2209_s10 = scalar_lea.vmem %s224_s11, 128  ;;  %p2217_p2 = scmp.lt.s32.totalorder %s224_s11, %s224_s11 }
  0x20   : > { %p2210_p10 = scmp.ne.s32.totalorder %s224_s11, %s2209_s10  ;;  %p2218_p6 = scmp.lt.s32.totalorder %s2209_s10, %s2209_s10 }
  0x22   : > { %p2212_p8 = pnand %p2210_p10, %p2537_p0  ;;  %p2219_p4 = por %p2218_p6, %p2217_p2 }
  0x24   : > { %p2213_p1 = pneg %p2212_p8 }
  0x26   : > { %p2220_p9 = pnand %p2219_p4, %p2213_p1 }
  0x28   : > { %2223 = shalt.err (!%p2220_p9)
}
  0x29   : > { %2086 = dma.hbm_to_vmem [thread:$0]  (!%p2521_p12), %s3009_s1, 128, %s224_s11, [#allocation6]  }
  0x2a   : > { %s2224_s19 = scalar_lea.hbm %s3010_s2, 6144 }
  0x2b   : > { %p2225_p8 = scmp.ne.s32.totalorder %s3010_s2, %s2224_s19  ;;  %p2231_p1 = scmp.lt.u32.totalorder %s2224_s19, %s3010_s2 }
  0x2d   : > { %p2227_p10 = pnand %p2225_p8, %p2537_p0 }
  0x2f   : > { %p2228_p2 = pneg %p2227_p10 }
  0x31   : > { %p2233_p4 = pnand %p2231_p1, %p2228_p2 }
  0x33   : > { %2236 = shalt.err (!%p2233_p4)
}
  0x34   : > { %s2237_s11 = scalar_lea.vmem %s2525_s13, 6144  ;;  %p2245_p3 = scmp.lt.s32.totalorder %s2525_s13, %s2525_s13 }
  0x35   : > { %p2238_p6 = scmp.ne.s32.totalorder %s2525_s13, %s2237_s11  ;;  %p2246_p5 = scmp.lt.s32.totalorder %s2237_s11, %s2237_s11 }
  0x37   : > { %p2240_p9 = pnand %p2238_p6, %p2537_p0  ;;  %p2247_p7 = por %p2246_p5, %p2245_p3 }
  0x39   : > { %p2241_p13 = pneg %p2240_p9 }
  0x3b   : > { %p2248_p11 = pnand %p2247_p7, %p2241_p13 }
  0x3d   : > { %2251 = shalt.err (!%p2248_p11)
}
  0x3e   : > { %s2419_s10 = smov 384   ;;  %s2420_s12 = smov 24  }
  0x3f   : > { %2089 = dma.hbm_to_vmem [thread:$0]  (!%p2521_p12), %s3010_s2, 6144, %s2525_s13, [#allocation6], %s2419_s10, %s2419_s10, %s2420_s12  }
  0x40   : > { %s2252_s20 = scalar_lea.hbm %s3011_s3, 6144 }
  0x41   : > { %p2253_p8 = scmp.ne.s32.totalorder %s3011_s3, %s2252_s20  ;;  %p2259_p1 = scmp.lt.u32.totalorder %s2252_s20, %s3011_s3 }
  0x43   : > { %p2255_p10 = pnand %p2253_p8, %p2537_p0 }
  0x45   : > { %p2256_p2 = pneg %p2255_p10 }
  0x47   : > { %p2261_p4 = pnand %p2259_p1, %p2256_p2 }
  0x49   : > { %2264 = shalt.err (!%p2261_p4)
}
  0x4a   : > { %s2265_s15 = scalar_lea.vmem %s247_s16, 6144  ;;  %p2273_p3 = scmp.lt.s32.totalorder %s247_s16, %s247_s16 }
  0x4b   : > { %p2266_p6 = scmp.ne.s32.totalorder %s247_s16, %s2265_s15  ;;  %p2274_p5 = scmp.lt.s32.totalorder %s2265_s15, %s2265_s15 }
  0x4d   : > { %p2268_p9 = pnand %p2266_p6, %p2537_p0  ;;  %p2275_p7 = por %p2274_p5, %p2273_p3 }
  0x4f   : > { %p2269_p13 = pneg %p2268_p9 }
  0x51   : > { %p2276_p11 = pnand %p2275_p7, %p2269_p13 }
  0x53   : > { %2279 = shalt.err (!%p2276_p11)
}
  0x54   : > { %2092 = dma.hbm_to_vmem [thread:$0]  (!%p2521_p12), %s3011_s3, 6144, %s247_s16, [#allocation9], %s2419_s10, %s2419_s10, %s2420_s12  }
  0x55   : > { %s2596_s22 = sadd.s32 1, %s2414_s27   ;;  %s34_s14 = sadd.s32 1, %s2410_s26 }
  0x56   : > { %s31_s18 = ssub.s32 %s2414_s27, %s2596_s22  ;;  %p41_p8 = scmp.ne.s32.totalorder %s2410_s26, %s2406_s25 }
  0x57   : > { %p32_p0 = scmp.eq.s32.totalorder %s31_s18, 0  ;;  %p42_p10 = scmp.eq.s32.totalorder %s2414_s27, 0 }
  0x58   : > { %p2104_p2 = scmp.lt.s32.totalorder %s2414_s27, 2  ;;  %p3024_p4 = scmp.eq.s32.totalorder %s2492_s28, 1 }
  0x59   : > { %s2606_s19 = scalar_select %p32_p0, %s2410_s26, %s34_s14  }
  0x5a   : > { %p43_p1 = por %p42_p10, %p41_p8  ;;  %p2610_p6 = por %p3024_p4, %p41_p8 }
  0x5b   : > { %s266_s21 = sand.u32 1, %s2410_s26   ;;  %s1483_s23 = sshll.u32 %s2414_s27, 9 }
  0x5c   : > { %s1455_s16 = sshll.u32 %s266_s21, 5  ;;  %s2619_s29 = scalar_lea.hbm %s3008_s0, %s1483_s23 }
  0x5d   : > { %s270_s11 = scalar_lea.vmem [#allocation2], %s1455_s16  ;;  %p2621_p12 = pnand %p2104_p2, %p43_p1 }
  0x5e   : > { %s277_s15 = sshll.u32 %s270_s11, 4  ;;  %s2627_s17 = scalar_lea.sflag [#allocation3], %s266_s21  ;;  %s2625_s15 = int_to_ptr.vmem [resolvable:$true] %s277_s15 }
  0x5f   : > { %s2280_s18 = scalar_lea.hbm %s2619_s29, 512  ;;  %p2282_p13 = pneg %p2621_p12 }
  0x60   : > { %p2281_p9 = scmp.ne.s32.totalorder %s2619_s29, %s2280_s18  ;;  %s2285_s16 = scalar_lea.hbm %s3008_s0, 1024 }
  0x61   : > { %p2286_p7 = scmp.lt.u32.totalorder %s2619_s29, %s3008_s0  ;;  %p2287_p11 = scmp.lt.u32.totalorder %s2285_s16, %s2280_s18 }
  0x62   : > { %p2283_p3 = pnand %p2282_p13, %p2281_p9  ;;  %p2289_p8 = scmp.lt.u32.totalorder %s2280_s18, %s2619_s29 }
  0x63   : > { %p2288_p0 = por %p2287_p11, %p2286_p7 }
  0x64   : > { %p2284_p5 = pneg %p2283_p3 }
  0x65   : > { %p2290_p10 = por %p2289_p8, %p2288_p0 }
  0x67   : > { %p2291_p2 = pnand %p2290_p10, %p2284_p5 }
  0x69   : > { %2294 = shalt.err (!%p2291_p2)
}
  0x6a   : > { %s2295_s21 = scalar_lea.vmem %s2625_s15, 512  ;;  %s2421_s11 = smov [#allocation2]  }
  0x6b   : > { %p2296_p1 = scmp.ne.s32.totalorder %s2625_s15, %s2295_s21  ;;  %s2300_s14 = sshll.u32 %s2421_s11, 4  ;;  %s2301_s14 = int_to_ptr.vmem [resolvable:$false] %s2300_s14 }
  0x6c   : > { %s2302_s23 = scalar_lea.vmem %s2301_s14, 1024  ;;  %p2303_p3 = scmp.lt.s32.totalorder %s2625_s15, %s2301_s14 }
  0x6d   : > { %p2298_p4 = pnand %p2296_p1, %p2282_p13  ;;  %p2304_p7 = scmp.lt.s32.totalorder %s2302_s23, %s2295_s21 }
  0x6f   : > { %p2299_p9 = pneg %p2298_p4  ;;  %p2305_p11 = por %p2304_p7, %p2303_p3 }
  0x71   : > { %p2306_p0 = pnand %p2305_p11, %p2299_p9 }
  0x73   : > { %2309 = shalt.err (!%p2306_p0)
}
  0x74   : > { %s2422_s18 = smov 128   ;;  %s2423_s16 = smov 8  }
  0x75   : > { %2096 = dma.hbm_to_vmem [thread:$0]  (!%p2621_p12), %s2619_s29, 512, %s2625_s15, %s2627_s17, %s2422_s18, %s2422_s18, %s2423_s16  }
  0x76   : > { %p3027_p13 = scmp.ne.s32.totalorder %s3021_s9, 0 }
  0x77   : > { %s2658_s10 = sand.u32 (!%p3027_p13), 1, %s2406_s25   ;;  %p3028_p5 = scmp.ne.s32.totalorder (!%p3027_p13), %s3019_s30, 0 }
  0x78   : > { %289 = sbr.rel (%p3027_p13) target bundleno = 1288 (0x508), region = 44  ;;  %s1459_s12 = sshll.u32 (!%p3027_p13), %s2658_s10, 5 }
  0x79   : > { %s292_s21 = scalar_lea.sflag (!%p3027_p13), [#allocation3], %s2658_s10  ;;  %s2662_s11 = scalar_lea.vmem (!%p3027_p13), [#allocation2], %s1459_s12 }
  0x7f   : > { %2381 = dma.done.wait (%p3028_p5), %s292_s21, 512  }
  0x80   : > { %2383 = vsyncadd (%p3028_p5), %s292_s21, 4294966784  ;;  %p3029_p12 = scmp.eq.s32.totalorder %s2492_s28, 0 }
  0x82   : > { %2385 = dma.done.wait (%p3029_p12), [#allocation6], 6272   ;;  %p3030_p8 = pmov %p3029_p12 }
  0x84   : > { %2387 = vsyncadd (%p3030_p8), [#allocation6], 4294961024  ;;  %p3031_p10 = pmov %p3030_p8 }
  0x85   : > { %p3032_p2 = pmov %p3030_p8 }
  0x86   : > { %2389 = dma.done.wait (%p3031_p10), [#allocation9], 6144  }
  0x87   : > { %2391 = vsyncadd (%p3032_p2), [#allocation9], 4294961152  ;;  %s2676_s9 = scalar_lea.vmem [#allocation10], %s1459_s12  ;;  %p3033_p1 = scmp.ne.s32.totalorder %s2492_s28, 0 }
  0x88   : > { %v344_v0 = vld [vmem:[#allocation5] sm:$0xff] (!%p3033_p1) }
  0x89   : > { %343 = sbr.rel (%p3033_p1) target bundleno = 144 (0x90), region = 64  ;;  %345 = vst [vmem:[#allocation11] sm:$0xff] (!%p3033_p1), %v344_v0 }
  0x90 PF: > { %v351_v1 = vld [vmem:[#allocation7 + $0x8] sm:$0xff]  ;;  %v354_v2 = vld [vmem:[#allocation7 + $0x20] sm:$0xff]  ;;  %v353_v5 = vld [vmem:[#allocation7 + $0x18] sm:$0xff]  ;;  %v2424_v8 = vmov 0.0   ;;  %vm2426_vm0 = vmmov 0   ;;  %s1484_s17 = sshll.u32 %s2492_s28, 9 }
  0x91   : > { %v350_v3 = vld [vmem:[#allocation7] sm:$0xff]  ;;  %v1751_v4 = vpack.c.bf16 %v354_v2, %v351_v1  ;;  %v357_v6 = vld [vmem:[#allocation7 + $0x38] sm:$0xff]  ;;  %v360_v7 = vld [vmem:[#allocation7 + $0x50] sm:$0xff]  ;;  %479 = vmatprep.mubr.f32.mxu0 %v2424_v8  ;;  %s1325_s14 = sshll.u32 %s2676_s9, 4  ;;  %s2427_s23 = smov [#allocation11]   ;;  %s2934_s14 = int_to_ptr.vmem [resolvable:$true] %s1325_s14 }
  0x92   : > { %v1753_v9 = vpack.c.bf16 %v353_v5, %v350_v3  ;;  %v1755_v10 = vpack.c.bf16 %v360_v7, %v357_v6  ;;  %v356_v11 = vld [vmem:[#allocation7 + $0x30] sm:$0xff]  ;;  %v359_v12 = vld [vmem:[#allocation7 + $0x48] sm:$0xff]  ;;  %v366_v14 = vld [vmem:[#allocation7 + $0x80] sm:$0xff]  ;;  %s1339_s18 = sshll.u32 %s2427_s23, 4  ;;  %s2932_s21 = scalar_lea.hbm %s3014_s6, %s1484_s17  ;;  %s2936_s18 = int_to_ptr.vmem [resolvable:$true] %s1339_s18 }
  0x93   : > { %v363_v13 = vld [vmem:[#allocation7 + $0x68] sm:$0xff]  ;;  %1752 = vmatprep.subr.bf16.mxu0 %v1751_v4  ;;  %v1757_v15 = vpack.c.bf16 %v359_v12, %v356_v11  ;;  %v362_v17 = vld [vmem:[#allocation7 + $0x60] sm:$0xff]  ;;  %v365_v18 = vld [vmem:[#allocation7 + $0x78] sm:$0xff]  ;;  %s2310_s30 = scalar_lea.vmem %s2934_s14, 512  ;;  %s2428_s29 = smov [#allocation10]  }
  0x94   : > { %1754 = vmatpush1.bf16.msra.mxu0 %v1753_v9  ;;  %v1759_v16 = vpack.c.bf16 %v366_v14, %v363_v13  ;;  %v369_v19 = vld [vmem:[#allocation7 + $0x98] sm:$0xff]  ;;  %v372_v20 = vld [vmem:[#allocation7 + $0xb0] sm:$0xff]  ;;  %v1761_v21 = vpack.c.bf16 %v365_v18, %v362_v17  ;;  %v371_v24 = vld [vmem:[#allocation7 + $0xa8] sm:$0xff]  ;;  %p2311_p4 = scmp.ne.s32.totalorder %s2934_s14, %s2310_s30  ;;  %s2314_s15 = sshll.u32 %s2428_s29, 4  ;;  %s2315_s15 = int_to_ptr.vmem [resolvable:$false] %s2314_s15 }
  0x95   : > { %1756 = vmatprep.subr.bf16.mxu0 %v1755_v10  ;;  %v368_v22 = vld [vmem:[#allocation7 + $0x90] sm:$0xff]  ;;  %v1763_v23 = vpack.c.bf16 %v372_v20, %v369_v19  ;;  %v355_v26 = vld [vmem:[#allocation7 + $0x28] sm:$0xff]  ;;  %v378_v28 = vld [vmem:[#allocation7 + $0xe0] sm:$0xff]  ;;  %s2316_s13 = scalar_lea.vmem %s2315_s15, 1024  ;;  %p2317_p7 = scmp.lt.s32.totalorder %s2934_s14, %s2315_s15 }
  0x96   : > { %v352_v25 = vld [vmem:[#allocation7 + $0x10] sm:$0xff]  ;;  %v375_v27 = vld [vmem:[#allocation7 + $0xc8] sm:$0xff]  ;;  %v358_v30 = vld [vmem:[#allocation7 + $0x40] sm:$0xff]  ;;  %v1765_v32 = vpack.c.bf16 %v371_v24, %v368_v22  ;;  %p2312_p9 = pnand %p2311_p4, %p2610_p6  ;;  %p2318_p11 = scmp.lt.s32.totalorder %s2316_s13, %s2310_s30 }
  0x97   : > { %v1783_v29 = vpack.c.bf16 %v355_v26, %v352_v25  ;;  %v361_v31 = vld [vmem:[#allocation7 + $0x58] sm:$0xff]  ;;  %v374_v33 = vld [vmem:[#allocation7 + $0xc0] sm:$0xff]  ;;  %v1767_v36 = vpack.c.bf16 %v378_v28, %v375_v27  ;;  %v364_v38 = vld [vmem:[#allocation7 + $0x70] sm:$0xff] }
  0x98   : > { %1758 = vmatpush1.bf16.msra.mxu0 %v1757_v15  ;;  %v377_v34 = vld [vmem:[#allocation7 + $0xd8] sm:$0xff]  ;;  %v1787_v35 = vpack.c.bf16 %v361_v31, %v358_v30  ;;  %v367_v39 = vld [vmem:[#allocation7 + $0x88] sm:$0xff]  ;;  %v384_v41 = vld [vmem:[#allocation7 + $0x110] sm:$0xff]  ;;  %p2313_p3 = pneg %p2312_p9  ;;  %p2319_p0 = por %p2318_p11, %p2317_p7 }
  0x99   : > { %1760 = vmatprep.subr.bf16.mxu0 %v1759_v16  ;;  %1784 = vmatprep.subr.bf16.mxu1 %v1783_v29  ;;  %v2682_v37 = vld [vmem:[%s2662_s11] sm:$0xff]  ;;  %v1791_v42 = vpack.c.bf16 %v367_v39, %v364_v38  ;;  %v370_v43 = vld [vmem:[#allocation7 + $0xa0] sm:$0xff]  ;;  %v1769_v45 = vpack.c.bf16 %v377_v34, %v374_v33  ;;  %v380_v47 = vld [vmem:[#allocation7 + $0xf0] sm:$0xff] }
  0x9a   : > { %1786 = vmatpush3.bf16.msra.mxu1 %v1783_v29  ;;  %v381_v40 = vld [vmem:[#allocation7 + $0xf8] sm:$0xff]  ;;  %1605 = vmatprep.mubr.f32.mxu1 %v2682_v37  ;;  %v383_v48 = vld [vmem:[#allocation7 + $0x108] sm:$0xff]  ;;  %v390_v50 = vld [vmem:[#allocation7 + $0x140] sm:$0xff]  ;;  %p2320_p13 = pnand %p2319_p0, %p2313_p3 }
  0x9b   : > { %1788 = vmatprep.subr.bf16.mxu1 %v1787_v35  ;;  %v373_v44 = vld [vmem:[#allocation7 + $0xb8] sm:$0xff]  ;;  %v1771_v46 = vpack.c.bf16 %v384_v41, %v381_v40  ;;  %v387_v49 = vld [vmem:[#allocation7 + $0x128] sm:$0xff]  ;;  %v376_v52 = vld [vmem:[#allocation7 + $0xd0] sm:$0xff]  ;;  %v1773_v54 = vpack.c.bf16 %v383_v48, %v380_v47 }
  0x9c   : > { %1762 = vmatpush1.bf16.msra.mxu0 %v1761_v21  ;;  %v1795_v51 = vpack.c.bf16 %v373_v44, %v370_v43  ;;  %v379_v53 = vld [vmem:[#allocation7 + $0xe8] sm:$0xff]  ;;  %v1775_v55 = vpack.c.bf16 %v390_v50, %v387_v49  ;;  %v386_v56 = vld [vmem:[#allocation7 + $0x120] sm:$0xff]  ;;  %v389_v57 = vld [vmem:[#allocation7 + $0x138] sm:$0xff] }
  0x9d   : > { %1764 = vmatprep.subr.bf16.mxu0 %v1763_v23  ;;  %v393_v58 = vld [vmem:[#allocation7 + $0x158] sm:$0xff]  ;;  %v396_v59 = vld [vmem:[#allocation7 + $0x170] sm:$0xff]  ;;  %v1799_v60 = vpack.c.bf16 %v379_v53, %v376_v52  ;;  %v382_v61 = vld [vmem:[#allocation7 + $0x100] sm:$0xff]  ;;  %v1777_v63 = vpack.c.bf16 %v389_v57, %v386_v56 }
  0x9e   : > { %1790 = vmatpush3.bf16.msra.mxu1 %v1787_v35  ;;  %v385_v62 = vld [vmem:[#allocation7 + $0x118] sm:$0xff]  ;;  %v1779_v0 = vpack.c.bf16 %v396_v59, %v393_v58  ;;  %v392_v1 = vld [vmem:[#allocation7 + $0x150] sm:$0xff]  ;;  %v395_v2 = vld [vmem:[#allocation7 + $0x168] sm:$0xff] }
  0x9f   : > { %1792 = vmatprep.subr.bf16.mxu1 %v1791_v42  ;;  %v590_v3 = vld [vmem:[#allocation8 + $0x8] sm:$0xff]  ;;  %v593_v4 = vld [vmem:[#allocation8 + $0x20] sm:$0xff]  ;;  %v1803_v5 = vpack.c.bf16 %v385_v62, %v382_v61  ;;  %v388_v6 = vld [vmem:[#allocation7 + $0x130] sm:$0xff]  ;;  %v1781_v9 = vpack.c.bf16 %v395_v2, %v392_v1 }
  0xa0   : > { %1766 = vmatpush1.bf16.msra.mxu0 %v1765_v32  ;;  %v391_v7 = vld [vmem:[#allocation7 + $0x148] sm:$0xff]  ;;  %v2685_v10 = vpack.c.bf16 %v593_v4, %v590_v3  ;;  %v589_v11 = vld [vmem:[#allocation8] sm:$0xff]  ;;  %v592_v12 = vld [vmem:[#allocation8 + $0x18] sm:$0xff] }
  0xa1   : > { %1768 = vmatprep.subr.bf16.mxu0 %v1767_v36  ;;  %v596_v13 = vld [vmem:[#allocation8 + $0x38] sm:$0xff]  ;;  %v599_v14 = vld [vmem:[#allocation8 + $0x50] sm:$0xff]  ;;  %v1807_v15 = vpack.c.bf16 %v391_v7, %v388_v6  ;;  %v394_v16 = vld [vmem:[#allocation7 + $0x160] sm:$0xff]  ;;  %v2687_v18 = vpack.c.bf16 %v592_v12, %v589_v11 }
  0xa2   : > { %1794 = vmatpush3.bf16.msra.mxu1 %v1791_v42  ;;  %v397_v17 = vld [vmem:[#allocation7 + $0x178] sm:$0xff]  ;;  %v2690_v19 = vpack.c.bf16 %v599_v14, %v596_v13  ;;  %v595_v20 = vld [vmem:[#allocation8 + $0x30] sm:$0xff]  ;;  %v598_v21 = vld [vmem:[#allocation8 + $0x48] sm:$0xff]  ;;  %v2425_v42 = vmov 0.0|0.0  }
  0xa3   : > { %1796 = vmatprep.subr.bf16.mxu1 %v1795_v51  ;;  %v602_v22 = vld [vmem:[#allocation8 + $0x68] sm:$0xff]  ;;  %v605_v23 = vld [vmem:[#allocation8 + $0x80] sm:$0xff]  ;;  %v1811_v24 = vpack.c.bf16 %v397_v17, %v394_v16  ;;  %v2694_v25 = vpack.c.bf16 %v598_v21, %v595_v20  ;;  %v604_v29 = vld [vmem:[#allocation8 + $0x78] sm:$0xff] }
  0xa4   : > { %1770 = vmatpush1.bf16.msra.mxu0 %v1769_v45  ;;  %v347_v26 = vld [vmem:[%s2662_s11 + $0x8] sm:$0xff]  ;;  %v2699_v27 = vpack.c.bf16 %v605_v23, %v602_v22  ;;  %v608_v30 = vld [vmem:[#allocation8 + $0x98] sm:$0xff]  ;;  %v611_v31 = vld [vmem:[#allocation8 + $0xb0] sm:$0xff] }
  0xa5   : > { %1772 = vmatprep.subr.bf16.mxu0 %v1771_v46  ;;  %v601_v28 = vld [vmem:[#allocation8 + $0x60] sm:$0xff]  ;;  %v591_v32 = vld [vmem:[#allocation8 + $0x10] sm:$0xff]  ;;  %v594_v33 = vld [vmem:[#allocation8 + $0x28] sm:$0xff]  ;;  %v2707_v36 = vpack.c.bf16 %v611_v31, %v608_v30  ;;  %v400_v31 = vlaneseq }
  0xa6   : > { %1798 = vmatpush3.bf16.msra.mxu1 %v1795_v51  ;;  %v2702_v34 = vpack.c.bf16 %v604_v29, %v601_v28  ;;  %v348_v35 = vld [vmem:[%s2662_s11 + $0x10] sm:$0xff]  ;;  %v2709_v40 = vpack.c.bf16 %v594_v33, %v591_v32  ;;  %v617_v41 = vld [vmem:[#allocation8 + $0xe0] sm:$0xff]  ;;  %v600_v44 = vld [vmem:[#allocation8 + $0x58] sm:$0xff] }
  0xa7   : > { %1800 = vmatprep.subr.bf16.mxu1 %v1799_v60  ;;  %v610_v38 = vld [vmem:[#allocation8 + $0xa8] sm:$0xff]  ;;  %v597_v43 = vld [vmem:[#allocation8 + $0x40] sm:$0xff]  ;;  %v349_v46 = vld [vmem:[%s2662_s11 + $0x18] sm:$0xff]  ;;  %v401_v32 = vshrl.u32 %v400_v31, 7  ;;  %s1312_s11 = scalar_lea.sflag [#allocation4], %s2658_s10 }
  0xa8   : > { %1774 = vmatpush1.bf16.msra.mxu0 %v1773_v54  ;;  %v614_v39 = vld [vmem:[#allocation8 + $0xc8] sm:$0xff]  ;;  %v613_v48 = vld [vmem:[#allocation8 + $0xc0] sm:$0xff]  ;;  %v616_v49 = vld [vmem:[#allocation8 + $0xd8] sm:$0xff]  ;;  %v2720_v51 = vpack.c.bf16 %v600_v44, %v597_v43 }
  0xa9   : > { %1776 = vmatprep.subr.bf16.mxu0 %v1775_v55  ;;  %v2717_v47 = vpack.c.bf16 %v617_v41, %v614_v39  ;;  %v620_v50 = vld [vmem:[#allocation8 + $0xf8] sm:$0xff]  ;;  %v623_v52 = vld [vmem:[#allocation8 + $0x110] sm:$0xff]  ;;  %v606_v54 = vld [vmem:[#allocation8 + $0x88] sm:$0xff]  ;;  %v2725_v55 = vpack.c.bf16 %v616_v49, %v613_v48  ;;  %v410_v33 = vsub.s32 2, %v401_v32  ;;  %v402_v49 = vsub.s32 0, %v401_v32 }
  0xaa   : > { %1802 = vmatpush3.bf16.msra.mxu1 %v1799_v60  ;;  %v603_v53 = vld [vmem:[#allocation8 + $0x70] sm:$0xff]  ;;  %v2729_v56 = vpack.c.bf16 %v623_v52, %v620_v50  ;;  %v622_v58 = vld [vmem:[#allocation8 + $0x108] sm:$0xff]  ;;  %v629_v61 = vld [vmem:[#allocation8 + $0x140] sm:$0xff]  ;;  %v406_v52 = vsub.s32 1, %v401_v32 }
  0xab   : > { %1804 = vmatprep.subr.bf16.mxu1 %v1803_v5  ;;  %v619_v57 = vld [vmem:[#allocation8 + $0xf0] sm:$0xff]  ;;  %v626_v59 = vld [vmem:[#allocation8 + $0x128] sm:$0xff]  ;;  %v2732_v60 = vpack.c.bf16 %v606_v54, %v603_v53  ;;  %v609_v62 = vld [vmem:[#allocation8 + $0xa0] sm:$0xff] }
  0xac   : > { %1778 = vmatpush1.bf16.msra.mxu0 %v1777_v63  ;;  %v612_v63 = vld [vmem:[#allocation8 + $0xb8] sm:$0xff]  ;;  %v2741_v1 = vpack.c.bf16 %v629_v61, %v626_v59  ;;  %v625_v2 = vld [vmem:[#allocation8 + $0x120] sm:$0xff]  ;;  %v635_v6 = vld [vmem:[#allocation8 + $0x170] sm:$0xff] }
  0xad   : > { %1780 = vmatprep.subr.bf16.mxu0 %v1779_v0  ;;  %v2738_v0 = vpack.c.bf16 %v622_v58, %v619_v57  ;;  %v628_v3 = vld [vmem:[#allocation8 + $0x138] sm:$0xff]  ;;  %v615_v7 = vld [vmem:[#allocation8 + $0xd0] sm:$0xff]  ;;  %v634_v14 = vld [vmem:[#allocation8 + $0x168] sm:$0xff] }
  0xae   : > { %1806 = vmatpush3.bf16.msra.mxu1 %v1803_v5  ;;  %v632_v4 = vld [vmem:[#allocation8 + $0x158] sm:$0xff]  ;;  %v2744_v5 = vpack.c.bf16 %v612_v63, %v609_v62  ;;  %v2748_v11 = vpack.c.bf16 %v628_v3, %v625_v2  ;;  %v631_v13 = vld [vmem:[#allocation8 + $0x150] sm:$0xff]  ;;  %v621_v16 = vld [vmem:[#allocation8 + $0x100] sm:$0xff] }
  0xaf   : > { %1808 = vmatprep.subr.bf16.mxu1 %v1807_v15  ;;  %v2751_v12 = vpack.c.bf16 %v635_v6, %v632_v4  ;;  %v624_v17 = vld [vmem:[#allocation8 + $0x118] sm:$0xff]  ;;  %v2758_v20 = vpack.c.bf16 %v634_v14, %v631_v13  ;;  %v627_v22 = vld [vmem:[#allocation8 + $0x130] sm:$0xff]  ;;  %v630_v23 = vld [vmem:[#allocation8 + $0x148] sm:$0xff] }
  0xb0   : > { %1782 = vmatpush1.bf16.msra.mxu0 %v1781_v9  ;;  %v618_v9 = vld [vmem:[#allocation8 + $0xe8] sm:$0xff]  ;;  %v2762_v21 = vpack.c.bf16 %v624_v17, %v621_v16  ;;  %v633_v28 = vld [vmem:[#allocation8 + $0x160] sm:$0xff]  ;;  %v636_v29 = vld [vmem:[#allocation8 + $0x178] sm:$0xff] }
  0xb1   : > { %1816 = vmatprep.subr.bf16.mxu0 %v2685_v10  ;;  %v2777_v30 = vpack.c.bf16 %v636_v29, %v633_v28  ;;  %v637_v50 = vld [vmem:[%s3013_s5] sm:$0x7] }
  0xb2   : > { %1810 = vmatpush3.bf16.msra.mxu1 %v1807_v15  ;;  %v2754_v15 = vpack.c.bf16 %v618_v9, %v615_v7  ;;  %v643_v54 = vrot.slane %v637_v50, %v402_v49  ;;  %v647_v58 = vrot.slane %v637_v50, %v406_v52  ;;  %v2834_v16 = vrot.slane %v637_v50, %v410_v33 }
  0xb3   : > { %480 = vmatmul.mubr.f32.vlgmr.msra.gmra.mrb[0].mxu0 %v2682_v37  ;;  %1812 = vmatprep.subr.bf16.mxu1 %v1811_v24  ;;  %v607_v37 = vld [vmem:[#allocation8 + $0x90] sm:$0xff] }
  0xb4   : > { %1818 = vmatpush1.bf16.msra.mxu0 %v2687_v18  ;;  %485 = vmatprep.mubr.f32.mxu0 %v2424_v8  ;;  %v2713_v45 = vpack.c.bf16 %v610_v38, %v607_v37 }
  0xb5   : > { %1820 = vmatprep.subr.bf16.mxu0 %v2690_v19 }
  0xb6   : > { %1814 = vmatpush3.bf16.msra.mxu1 %v1811_v24  ;;  %v2766_v24 = vld [vmem:[#allocation11] sm:$0xff] }
  0xb7   : > { %486 = vmatmul.mubr.f32.gmra.mrb[2].mxu0 %v347_v26  ;;  %1847 = vmatprep.subr.bf16.mxu1 %v2425_v42 }
  0xb8   : > { %1822 = vmatpush1.bf16.msra.mxu0 %v2694_v25  ;;  %491 = vmatprep.mubr.f32.mxu0 %v2424_v8 }
  0xb9   : > { %1824 = vmatprep.subr.bf16.mxu0 %v2699_v27  ;;  %1606 = vmatmul.mubr.f32.vlgmr.msra.gmra.mrb[0].mxu1 %v347_v26  ;;  %v2769_v26 = vpack.c.bf16 %v630_v23, %v627_v22 }
  0xba   : > { %1849 = vmatpush3.bf16.msra.mxu1 %v2709_v40  ;;  %1608 = vmatprep.mubr.f32.mxu1 %v348_v35 }
  0xbb   : > { %492 = vmatmul.mubr.f32.gmra.mrb[4].mxu0 %v348_v35  ;;  %1850 = vmatprep.subr.bf16.mxu1 %v2425_v42  ;;  %v398_v35 = vld [vmem:[%s3012_s4] sm:$0x7] }
  0xbc   : > { %1826 = vmatpush1.bf16.msra.mxu0 %v2702_v34  ;;  %497 = vmatprep.mubr.f32.mxu0 %v2424_v8  ;;  %v411_v37 = vrot.slane %v398_v35, %v410_v33  ;;  %v403_v53 = vrot.slane %v398_v35, %v402_v49  ;;  %v407_v57 = vrot.slane %v398_v35, %v406_v52 }
  0xbd   : > { %1828 = vmatprep.subr.bf16.mxu0 %v2707_v36  ;;  %1609 = vmatmul.mubr.f32.gmra.mrb[2].mxu1 %v349_v46 }
  0xbe   : > { %1852 = vmatpush3.bf16.msra.mxu1 %v2720_v51  ;;  %1643 = vmatprep.mubr.msk.f32.mxu1 %vm2426_vm0, %v2424_v8  ;;  %v2828_v59 = vadd.f32 %v643_v54, %v403_v53  ;;  %v2830_v62 = vadd.f32 %v647_v58, %v407_v57 }
  0xbf   : > { %498 = vmatmul.mubr.f32.gmra.mrb[6].mxu0 %v349_v46  ;;  %1853 = vmatprep.subr.bf16.mxu1 %v2425_v42 }
  0xc0   : > { %1830 = vmatpush1.bf16.msra.mxu0 %v2713_v45  ;;  %719 = vmatprep.mubr.f32.mxu0 %v2424_v8 }
  0xc1   : > { %1832 = vmatprep.subr.bf16.mxu0 %v2717_v47 }
  0xc2   : > { %1855 = vmatpush3.bf16.msra.mxu1 %v2732_v60 }
  0xc3   : > { %1856 = vmatprep.subr.bf16.mxu1 %v2425_v42 }
  0xc4   : > { %1834 = vmatpush1.bf16.msra.mxu0 %v2725_v55 }
  0xc5   : > { %1836 = vmatprep.subr.bf16.mxu0 %v2729_v56 }
  0xc6   : > { %1858 = vmatpush3.bf16.msra.mxu1 %v2744_v5 }
  0xc7   : > { %1859 = vmatprep.subr.bf16.mxu1 %v2425_v42 }
  0xc8   : > { %1838 = vmatpush1.bf16.msra.mxu0 %v2738_v0 }
  0xc9   : > { %1840 = vmatprep.subr.bf16.mxu0 %v2741_v1 }
  0xca   : > { %1861 = vmatpush3.bf16.msra.mxu1 %v2754_v15 }
  0xcb   : > { %1862 = vmatprep.subr.bf16.mxu1 %v2425_v42 }
  0xcc   : > { %1842 = vmatpush1.bf16.msra.mxu0 %v2748_v11 }
  0xcd   : > { %1844 = vmatprep.subr.bf16.mxu0 %v2751_v12 }
  0xce   : > { %1864 = vmatpush3.bf16.msra.mxu1 %v2762_v21 }
  0xcf   : > { %1865 = vmatprep.subr.bf16.mxu1 %v2425_v42 }
  0xd0   : > { %1846 = vmatpush1.bf16.msra.mxu0 %v2758_v20 }
  0xd1   : > { %1872 = vmatprep.subr.bf16.mxu0 %v2685_v10 }
  0xd2   : > { %1867 = vmatpush3.bf16.msra.mxu1 %v2769_v26 }
  0xd3   : > { %720 = vmatmul.mubr.f32.vlgmr.msra.gmra.mrb[0].mxu0 %v2766_v24  ;;  %1868 = vmatprep.subr.bf16.mxu1 %v2425_v42 }
  0xd4   : > { %1874 = vmatpush1.bf16.msra.mxu0 %v2687_v18  ;;  %882 = vmatprep.mubr.f32.mxu0 %v2424_v8 }
  0xd5   : > { %1876 = vmatprep.subr.bf16.mxu0 %v2690_v19 }
  0xd6   : > { %1870 = vmatpush3.bf16.msra.mxu1 %v2777_v30 }
  0xd7   : > { %1903 = vmatprep.subr.bf16.mxu1 %v2425_v42 }
  0xd8   : > { %1878 = vmatpush1.bf16.msra.mxu0 %v2694_v25 }
  0xd9   : > { %1880 = vmatprep.subr.bf16.mxu0 %v2699_v27  ;;  %1644 = vmatmul.mubr.f32.vlgmr.msra.gmra.mrb[4].mxu1 %v2766_v24 }
  0xda   : > { %1905 = vmatpush3.bf16.msra.mxu1 %v2709_v40  ;;  %1678 = vmatprep.mubr.msk.f32.mxu1 %vm2426_vm0, %v2424_v8 }
  0xdb   : > { %1906 = vmatprep.subr.bf16.mxu1 %v2425_v42 }
  0xdc   : > { %1882 = vmatpush1.bf16.msra.mxu0 %v2702_v34 }
  0xdd   : > { %1884 = vmatprep.subr.bf16.mxu0 %v2707_v36 }
  0xde   : > { %1908 = vmatpush3.bf16.msra.mxu1 %v2720_v51 }
  0xdf   : > { %1909 = vmatprep.subr.bf16.mxu1 %v2425_v42 }
  0xe0   : > { %1886 = vmatpush1.bf16.msra.mxu0 %v2713_v45 }
  0xe1   : > { %1888 = vmatprep.subr.bf16.mxu0 %v2717_v47 }
  0xe2   : > { %1911 = vmatpush3.bf16.msra.mxu1 %v2732_v60 }
  0xe3   : > { %1912 = vmatprep.subr.bf16.mxu1 %v2425_v42 }
  0xe4   : > { %1890 = vmatpush1.bf16.msra.mxu0 %v2725_v55 }
  0xe5   : > { %1892 = vmatprep.subr.bf16.mxu0 %v2729_v56 }
  0xe6   : > { %1914 = vmatpush3.bf16.msra.mxu1 %v2744_v5 }
  0xe7   : > { %1915 = vmatprep.subr.bf16.mxu1 %v2425_v42 }
  0xe8   : > { %1894 = vmatpush1.bf16.msra.mxu0 %v2738_v0 }
  0xe9   : > { %1896 = vmatprep.subr.bf16.mxu0 %v2741_v1 }
  0xea   : > { %1917 = vmatpush3.bf16.msra.mxu1 %v2754_v15 }
  0xeb   : > { %1918 = vmatprep.subr.bf16.mxu1 %v2425_v42 }
  0xec   : > { %1898 = vmatpush1.bf16.msra.mxu0 %v2748_v11 }
  0xed   : > { %1900 = vmatprep.subr.bf16.mxu0 %v2751_v12 }
  0xee   : > { %1920 = vmatpush3.bf16.msra.mxu1 %v2762_v21 }
  0xef   : > { %1921 = vmatprep.subr.bf16.mxu1 %v2425_v42 }
  0xf0   : > { %1902 = vmatpush1.bf16.msra.mxu0 %v2758_v20 }
  0xf1   : > { %1928 = vmatprep.subr.bf16.mxu0 %v2685_v10 }
  0xf2   : > { %1923 = vmatpush3.bf16.msra.mxu1 %v2769_v26 }
  0xf3   : > { %1924 = vmatprep.subr.bf16.mxu1 %v2425_v42 }
  0xf6   : > { %1926 = vmatpush3.bf16.msra.mxu1 %v2777_v30 }
  0xf7   : > { %1959 = vmatprep.subr.bf16.mxu1 %v2425_v42 }
 0x18c   : > { %v1607_v38 = vpop.f32.mrb[0].mxu1 }
 0x18d   : > { %v2819_v39 = vadd.f32 %v1607_v38, %v411_v37  ;;  %v570_v41 = vpop.f32.mrb[1].mxu1 }
 0x18e   : > { %v571_v29 = vadd.f32 %v570_v41, %v411_v37 }
 0x190   : > { %v1610_v43 = vpop.f32.mrb[2].mxu1 }
 0x191   : > { %v2821_v44 = vadd.f32 %v1610_v43, %v411_v37  ;;  %v580_v46 = vpop.f32.mrb[3].mxu1 }
 0x192   : > { %v2823_v48 = vadd.f32 %v580_v46, %v411_v37 }
 0x1a6   : > { %v721_v61 = vpop.f32.mrb[0].mxu0 }
 0x1a7   : > { %v2040_v63 = vadd.f32 %v2828_v59, %v721_v61  ;;  %v723_v2 = vpop.f32.mrb[1].mxu0 }
 0x1a8   : > { %v2042_v4 = vadd.f32 %v2830_v62, %v723_v2 }
 0x1a9   : > { %v1465_v3 = vmul.f32 -1.442695, %v2040_v63 }
 0x1aa   : > { %v1466_v6 = vmul.f32 -1.442695, %v2042_v4 }
 0x1ab   : > { %2156 = vpow2.f32 %v1465_v3 }
 0x1ac   : > { %v792_v7 = vpop.f32.mrb[4].mxu1  ;;  %2158 = vpow2.f32 %v1466_v6 }
 0x1ad   : > { %v1645_v9 = vpop.f32.mrb[5].mxu1  ;;  %v793_v23 = vadd.f32 %v792_v7, %v2834_v16 }
 0x1b5   : > { %v2157_v13 = vpop.eup %2156 }
 0x1b6   : > { %v800_v14 = vadd.f32 1.0, %v2157_v13  ;;  %v2159_v17 = vpop.eup %2158 }
 0x1b7   : > { %v807_v22 = vadd.f32 1.0, %v2159_v17 }
 0x1b8   : > { %2160 = vrcp.f32 %v800_v14 }
 0x1b9   : > { %2162 = vrcp.f32 %v807_v22 }
 0x1c2   : > { %v2161_v28 = vpop.eup %2160 }
 0x1c3   : > { %v810_v31 = vmul.f32 %v2161_v28, %v793_v23  ;;  %v2163_v35 = vpop.eup %2162 }
 0x1c4   : > { %v813_v38 = vsub.f32 1.0, %v2163_v35  ;;  %v815_v49 = vmul.f32 %v2163_v35, %v2766_v24 }
 0x1c5   : > { %v811_v32 = vadd.f32 %v810_v31, %v571_v29 }
 0x1c7   : > { %2164 = vtanh.f32 %v811_v32 }
 0x1d1   : > { %v2165_v43 = vpop.eup %2164 }
 0x1d2   : > { %v814_v46 = vmul.f32 %v2165_v43, %v813_v38 }
 0x1d4   : > { %v2838_v52 = vadd.f32 %v815_v49, %v814_v46 }
 0x1d6   : > { %817 = vst [vmem:[%s2676_s9] sm:$0xff] %v2838_v52  ;;  %883 = vmatmul.mubr.f32.vlgmr.msra.gmra.mrb[2].mxu0 %v2838_v52  ;;  %1679 = vmatmul.mubr.f32.vlgmr.msra.gmra.mrb[6].mxu1 %v2838_v52 }
 0x1d7   : > { %1930 = vmatpush1.bf16.msra.mxu0 %v2687_v18  ;;  %1961 = vmatpush3.bf16.msra.mxu1 %v2709_v40 }
 0x1d8   : > { %1932 = vmatprep.subr.bf16.mxu0 %v2690_v19  ;;  %1962 = vmatprep.subr.bf16.mxu1 %v2425_v42 }
 0x1d9   : > { %1046 = vmatprep.mubr.f32.mxu0 %v2424_v8  ;;  %1713 = vmatprep.mubr.msk.f32.mxu1 %vm2426_vm0, %v2424_v8 }
 0x1db   : > { %1934 = vmatpush1.bf16.msra.mxu0 %v2694_v25  ;;  %1964 = vmatpush3.bf16.msra.mxu1 %v2720_v51 }
 0x1dc   : > { %1936 = vmatprep.subr.bf16.mxu0 %v2699_v27  ;;  %1965 = vmatprep.subr.bf16.mxu1 %v2425_v42 }
 0x1df   : > { %1938 = vmatpush1.bf16.msra.mxu0 %v2702_v34  ;;  %1967 = vmatpush3.bf16.msra.mxu1 %v2732_v60 }
 0x1e0   : > { %1940 = vmatprep.subr.bf16.mxu0 %v2707_v36  ;;  %1968 = vmatprep.subr.bf16.mxu1 %v2425_v42 }
 0x1e3   : > { %1942 = vmatpush1.bf16.msra.mxu0 %v2713_v45  ;;  %1970 = vmatpush3.bf16.msra.mxu1 %v2744_v5 }
 0x1e4   : > { %1944 = vmatprep.subr.bf16.mxu0 %v2717_v47  ;;  %1971 = vmatprep.subr.bf16.mxu1 %v2425_v42 }
 0x1e7   : > { %1946 = vmatpush1.bf16.msra.mxu0 %v2725_v55  ;;  %1973 = vmatpush3.bf16.msra.mxu1 %v2754_v15 }
 0x1e8   : > { %1948 = vmatprep.subr.bf16.mxu0 %v2729_v56  ;;  %1974 = vmatprep.subr.bf16.mxu1 %v2425_v42 }
 0x1eb   : > { %1950 = vmatpush1.bf16.msra.mxu0 %v2738_v0  ;;  %1976 = vmatpush3.bf16.msra.mxu1 %v2762_v21 }
 0x1ec   : > { %1952 = vmatprep.subr.bf16.mxu0 %v2741_v1  ;;  %1977 = vmatprep.subr.bf16.mxu1 %v2425_v42 }
 0x1ef   : > { %1954 = vmatpush1.bf16.msra.mxu0 %v2748_v11  ;;  %1979 = vmatpush3.bf16.msra.mxu1 %v2769_v26 }
 0x1f0   : > { %1956 = vmatprep.subr.bf16.mxu0 %v2751_v12  ;;  %1980 = vmatprep.subr.bf16.mxu1 %v2425_v42 }
 0x1f3   : > { %1958 = vmatpush1.bf16.msra.mxu0 %v2758_v20  ;;  %1982 = vmatpush3.bf16.msra.mxu1 %v2777_v30 }
 0x1f4   : > { %1984 = vmatprep.subr.bf16.mxu0 %v2685_v10  ;;  %2015 = vmatprep.subr.bf16.mxu1 %v2425_v42 }
 0x2a9   : > { %v884_v24 = vpop.f32.mrb[2].mxu0  ;;  %v955_v33 = vpop.f32.mrb[6].mxu1 }
 0x2aa   : > { %v2044_v37 = vadd.f32 %v2828_v59, %v884_v24  ;;  %v886_v41 = vpop.f32.mrb[3].mxu0  ;;  %v1680_v50 = vpop.f32.mrb[7].mxu1  ;;  %v956_v2 = vadd.f32 %v955_v33, %v2834_v16 }
 0x2ab   : > { %v2046_v54 = vadd.f32 %v2830_v62, %v886_v41 }
 0x2ac   : > { %v1467_v53 = vmul.f32 -1.442695, %v2044_v37 }
 0x2ad   : > { %v1468_v57 = vmul.f32 -1.442695, %v2046_v54 }
 0x2ae   : > { %2166 = vpow2.f32 %v1467_v53 }
 0x2af   : > { %2168 = vpow2.f32 %v1468_v57 }
 0x2b8   : > { %v2167_v58 = vpop.eup %2166 }
 0x2b9   : > { %v963_v61 = vadd.f32 1.0, %v2167_v58  ;;  %v2169_v63 = vpop.eup %2168 }
 0x2ba   : > { %v970_v10 = vadd.f32 1.0, %v2169_v63 }
 0x2bb   : > { %2170 = vrcp.f32 %v963_v61 }
 0x2bc   : > { %2172 = vrcp.f32 %v970_v10 }
 0x2c5   : > { %v2171_v3 = vpop.eup %2170 }
 0x2c6   : > { %v973_v4 = vmul.f32 %v2171_v3, %v956_v2  ;;  %v2173_v7 = vpop.eup %2172 }
 0x2c7   : > { %v976_v9 = vsub.f32 1.0, %v2173_v7  ;;  %v978_v17 = vmul.f32 %v2173_v7, %v2838_v52 }
 0x2c8   : > { %v974_v6 = vadd.f32 %v973_v4, %v2819_v39 }
 0x2ca   : > { %2174 = vtanh.f32 %v974_v6 }
 0x2d4   : > { %v2175_v13 = vpop.eup %2174 }
 0x2d5   : > { %v977_v14 = vmul.f32 %v2175_v13, %v976_v9 }
 0x2d7   : > { %v979_v22 = vadd.f32 %v978_v17, %v977_v14 }
 0x2d9   : > { %1469 = vst [vmem:[%s2676_s9 + $0x8] sm:$0xff] %v979_v22  ;;  %1047 = vmatmul.mubr.f32.vlgmr.msra.gmra.mrb[4].mxu0 %v979_v22  ;;  %1714 = vmatmul.mubr.f32.vlgmr.msra.gmra.mrb[8].mxu1 %v979_v22 }
 0x2da   : > { %1986 = vmatpush1.bf16.msra.mxu0 %v2687_v18  ;;  %2017 = vmatpush3.bf16.msra.mxu1 %v2709_v40 }
 0x2db   : > { %1988 = vmatprep.subr.bf16.mxu0 %v2690_v19  ;;  %2018 = vmatprep.subr.bf16.mxu1 %v2425_v42 }
 0x2dc   : > { %1210 = vmatprep.mubr.f32.mxu0 %v2424_v8  ;;  %1748 = vmatprep.mubr.msk.f32.mxu1 %vm2426_vm0, %v2424_v8 }
 0x2de   : > { %1990 = vmatpush1.bf16.msra.mxu0 %v2694_v25  ;;  %2020 = vmatpush3.bf16.msra.mxu1 %v2720_v51 }
 0x2df   : > { %1992 = vmatprep.subr.bf16.mxu0 %v2699_v27  ;;  %2021 = vmatprep.subr.bf16.mxu1 %v2425_v42 }
 0x2e2   : > { %1994 = vmatpush1.bf16.msra.mxu0 %v2702_v34  ;;  %2023 = vmatpush3.bf16.msra.mxu1 %v2732_v60 }
 0x2e3   : > { %1996 = vmatprep.subr.bf16.mxu0 %v2707_v36  ;;  %2024 = vmatprep.subr.bf16.mxu1 %v2425_v42 }
 0x2e6   : > { %1998 = vmatpush1.bf16.msra.mxu0 %v2713_v45  ;;  %2026 = vmatpush3.bf16.msra.mxu1 %v2744_v5 }
 0x2e7   : > { %2000 = vmatprep.subr.bf16.mxu0 %v2717_v47  ;;  %2027 = vmatprep.subr.bf16.mxu1 %v2425_v42 }
 0x2ea   : > { %2002 = vmatpush1.bf16.msra.mxu0 %v2725_v55  ;;  %2029 = vmatpush3.bf16.msra.mxu1 %v2754_v15 }
 0x2eb   : > { %2004 = vmatprep.subr.bf16.mxu0 %v2729_v56  ;;  %2030 = vmatprep.subr.bf16.mxu1 %v2425_v42 }
 0x2ee   : > { %2006 = vmatpush1.bf16.msra.mxu0 %v2738_v0  ;;  %2032 = vmatpush3.bf16.msra.mxu1 %v2762_v21 }
 0x2ef   : > { %2008 = vmatprep.subr.bf16.mxu0 %v2741_v1  ;;  %2033 = vmatprep.subr.bf16.mxu1 %v2425_v42 }
 0x2f2   : > { %2010 = vmatpush1.bf16.msra.mxu0 %v2748_v11  ;;  %2035 = vmatpush3.bf16.msra.mxu1 %v2769_v26 }
 0x2f3   : > { %2012 = vmatprep.subr.bf16.mxu0 %v2751_v12  ;;  %2036 = vmatprep.subr.bf16.mxu1 %v2425_v42 }
 0x2f6   : > { %2014 = vmatpush1.bf16.msra.mxu0 %v2758_v20  ;;  %2038 = vmatpush3.bf16.msra.mxu1 %v2777_v30 }
 0x3ac   : > { %v1048_v8 = vpop.f32.mrb[4].mxu0  ;;  %v1119_v18 = vpop.f32.mrb[8].mxu1 }
 0x3ad   : > { %v2048_v19 = vadd.f32 %v2828_v59, %v1048_v8  ;;  %v1050_v25 = vpop.f32.mrb[5].mxu0  ;;  %v1715_v27 = vpop.f32.mrb[9].mxu1  ;;  %v1120_v55 = vadd.f32 %v1119_v18, %v2834_v16 }
 0x3ae   : > { %v2050_v36 = vadd.f32 %v2830_v62, %v1050_v25 }
 0x3af   : > { %v1470_v34 = vmul.f32 -1.442695, %v2048_v19 }
 0x3b0   : > { %v1471_v40 = vmul.f32 -1.442695, %v2050_v36 }
 0x3b1   : > { %2176 = vpow2.f32 %v1470_v34 }
 0x3b2   : > { %2178 = vpow2.f32 %v1471_v40 }
 0x3bb   : > { %v2177_v45 = vpop.eup %2176 }
 0x3bc   : > { %v1127_v47 = vadd.f32 1.0, %v2177_v45  ;;  %v2179_v42 = vpop.eup %2178 }
 0x3bd   : > { %v1134_v51 = vadd.f32 1.0, %v2179_v42 }
 0x3be   : > { %2180 = vrcp.f32 %v1127_v47 }
 0x3bf   : > { %2182 = vrcp.f32 %v1134_v51 }
 0x3c8   : > { %v2181_v56 = vpop.eup %2180 }
 0x3c9   : > { %v1137_v60 = vmul.f32 %v2181_v56, %v1120_v55  ;;  %v2183_v1 = vpop.eup %2182 }
 0x3ca   : > { %v1140_v5 = vsub.f32 1.0, %v2183_v1  ;;  %v1142_v15 = vmul.f32 %v2183_v1, %v979_v22 }
 0x3cb   : > { %v1138_v0 = vadd.f32 %v1137_v60, %v2823_v48 }
 0x3cd   : > { %2184 = vtanh.f32 %v1138_v0 }
 0x3d7   : > { %v2185_v11 = vpop.eup %2184 }
 0x3d8   : > { %v1141_v12 = vmul.f32 %v2185_v11, %v1140_v5 }
 0x3da   : > { %v1143_v20 = vadd.f32 %v1142_v15, %v1141_v12 }
 0x3dc   : > { %1472 = vst [vmem:[%s2676_s9 + $0x10] sm:$0xff] %v1143_v20  ;;  %1211 = vmatmul.mubr.f32.vlgmr.msra.gmra.mrb[6].mxu0 %v1143_v20  ;;  %1749 = vmatmul.mubr.f32.vlgmr.msra.gmra.mrb[10].mxu1 %v1143_v20 }
 0x4af   : > { %v1212_v21 = vpop.f32.mrb[6].mxu0  ;;  %v1283_v26 = vpop.f32.mrb[10].mxu1 }
 0x4b0   : > { %v2052_v30 = vadd.f32 %v2828_v59, %v1212_v21  ;;  %v1214_v39 = vpop.f32.mrb[7].mxu0  ;;  %v1750_v23 = vpop.f32.mrb[11].mxu1  ;;  %v1284_v43 = vadd.f32 %v1283_v26, %v2834_v16 }
 0x4b1   : > { %v2054_v29 = vadd.f32 %v2830_v62, %v1214_v39 }
 0x4b2   : > { %v1473_v28 = vmul.f32 -1.442695, %v2052_v30 }
 0x4b3   : > { %v1474_v48 = vmul.f32 -1.442695, %v2054_v29 }
 0x4b4   : > { %2186 = vpow2.f32 %v1473_v28 }
 0x4b5   : > { %2188 = vpow2.f32 %v1474_v48 }
 0x4be   : > { %v2187_v31 = vpop.eup %2186 }
 0x4bf   : > { %v1291_v32 = vadd.f32 1.0, %v2187_v31  ;;  %v2189_v35 = vpop.eup %2188 }
 0x4c0   : > { %v1298_v38 = vadd.f32 1.0, %v2189_v35 }
 0x4c1   : > { %2190 = vrcp.f32 %v1291_v32 }
 0x4c2   : > { %2192 = vrcp.f32 %v1298_v38 }
 0x4cb   : > { %v2191_v46 = vpop.eup %2190 }
 0x4cc   : > { %v1301_v49 = vmul.f32 %v2191_v46, %v1284_v43  ;;  %v2193_v62 = vpop.eup %2192 }
 0x4cd   : > { %v1304_v52 = vsub.f32 1.0, %v2193_v62  ;;  %v1306_v37 = vmul.f32 %v2193_v62, %v1143_v20 }
 0x4ce   : > { %v1302_v59 = vadd.f32 %v1301_v49, %v2821_v44 }
 0x4d0   : > { %2194 = vtanh.f32 %v1302_v59 }
 0x4da   : > { %v2195_v24 = vpop.eup %2194 }
 0x4db   : > { %v1305_v33 = vmul.f32 %v2195_v24, %v1304_v52 }
 0x4dd   : > { %v1307_v44 = vadd.f32 %v1306_v37, %v1305_v33 }
 0x4df   : > { %1475 = vst [vmem:[%s2676_s9 + $0x18] sm:$0xff] %v1307_v44  ;;  %1310 = vst [vmem:[#allocation11] sm:$0xff] %v1307_v44 }
 0x4e0   : > { %2323 = shalt.err (!%p2320_p13)
}
 0x4e1   : > { %s2324_s9 = scalar_lea.hbm %s2932_s21, 512  ;;  %s2328_s16 = scalar_lea.hbm %s3014_s6, 1024 }
 0x4e2   : > { %p2325_p5 = scmp.ne.s32.totalorder %s2932_s21, %s2324_s9  ;;  %p2329_p10 = scmp.lt.u32.totalorder %s2932_s21, %s3014_s6 }
 0x4e3   : > { %p2330_p2 = scmp.lt.u32.totalorder %s2328_s16, %s2324_s9  ;;  %p2332_p4 = scmp.lt.u32.totalorder %s2324_s9, %s2932_s21 }
 0x4e4   : > { %p2326_p12 = pnand %p2325_p5, %p2610_p6 }
 0x4e5   : > { %p2331_p1 = por %p2330_p2, %p2329_p10 }
 0x4e6   : > { %p2327_p8 = pneg %p2326_p12 }
 0x4e7   : > { %p2333_p9 = por %p2332_p4, %p2331_p1 }
 0x4e9   : > { %p2334_p3 = pnand %p2333_p9, %p2327_p8 }
 0x4eb   : > { %2337 = shalt.err (!%p2334_p3)
}
 0x4ec   : > { %s2429_s30 = smov 128   ;;  %s2430_s15 = smov 8  }
 0x4ed   : > { %2077 = dma.vmem_to_hbm [thread:$0]  (%p2610_p6), %s2934_s14, 512, %s2932_s21, %s1312_s11, %s2429_s30, %s2429_s30, %s2430_s15  }
 0x4ee   : > { %s2338_s13 = scalar_lea.vmem %s2936_s18, 128  ;;  %p3034_p11 = scmp.eq.s32.totalorder %s2492_s28, 1 }
 0x4ef   : > { %p2339_p7 = scmp.ne.s32.totalorder %s2936_s18, %s2338_s13  ;;  %p2345_p5 = scmp.lt.s32.totalorder %s2936_s18, %s2936_s18 }
 0x4f0   : > { %p2346_p12 = scmp.lt.s32.totalorder %s2338_s13, %s2338_s13 }
 0x4f1   : > { %p2340_p0 = pnand %p2339_p7, %p3034_p11 }
 0x4f2   : > { %p2347_p8 = por %p2346_p12, %p2345_p5 }
 0x4f3   : > { %p2341_p13 = pneg %p2340_p0 }
 0x4f5   : > { %p2348_p10 = pnand %p2347_p8, %p2341_p13 }
 0x4f7   : > { %2351 = shalt.err (!%p2348_p10)
}
 0x4f8   : > { %s2352_s23 = scalar_lea.hbm %s3015_s7, 128  ;;  %p3035_p2 = pmov %p3034_p11 }
 0x4f9   : > { %p2353_p6 = scmp.ne.s32.totalorder %s3015_s7, %s2352_s23  ;;  %p2358_p9 = scmp.lt.u32.totalorder %s2352_s23, %s3015_s7 }
 0x4fb   : > { %p2354_p1 = pnand %p2353_p6, %p3035_p2 }
 0x4fd   : > { %p2355_p4 = pneg %p2354_p1 }
 0x4ff   : > { %p2360_p3 = pnand %p2358_p9, %p2355_p4 }
 0x501   : > { %2363 = shalt.err (!%p2360_p3)
}
 0x502   : > { %p3036_p7 = pmov %p3035_p2  ;;  %p3037_p11 = pmov %p3035_p2 }
 0x504   : > { %2079 = dma.vmem_to_hbm [thread:$0]  (%p3036_p7), %s2936_s18, 128, %s3015_s7, [#allocation12]  }
 0x505   : > { %2393 = dma.done.wait (%p3037_p11), [#allocation12], 128   ;;  %p3038_p0 = pmov %p3035_p2 }
 0x507   : > { %2395 = vsyncadd (%p3038_p0), [#allocation12], 4294967168 }
 0x508 PF: > { %s1355_s12 = sand.u32 1, %s2402_s24   ;;  %p3039_p13 = scmp.ne.s32.totalorder %s3020_s8, 0 }
 0x509   : > { %p3040_p5 = scmp.ge.s32.totalorder %s2414_s27, 2  ;;  %s1356_s29 = scalar_lea.sflag [#allocation4], %s1355_s12 }
 0x50b   : > { %p2098_p12 = pnand %p3040_p5, %p3039_p13 }
 0x50d   : > { %2397 = dma.done.wait (!%p2098_p12), %s1356_s29, 512  }
 0x50e   : > { %2399 = vsyncadd (!%p2098_p12), %s1356_s29, 4294966784  ;;  %p24_p8 = scmp.ge.s32.totalorder %s2596_s22, 4   ;;  %s3041_s24 = smov %s2406_s25 }
 0x50f   : > { %s3042_s25 = smov %s2410_s26  ;;  %s3043_s26 = smov %s2606_s19 }
 0x510   : > { %s3044_s27 = smov %s2596_s22  ;;  %26 = sbr.rel (!%p24_p8) target bundleno = 8 (0x8), region = 116 }
 0x517   :  { %1361 = vsyncpa [#allocation3], 1 }
 0x518   :  { %1363 = vsyncpa [#allocation3 + $0x1], 1 }
 0x519   :  { %1364 = vsyncpa [#allocation6], 1 }
 0x51a   :  { %1365 = vsyncpa [#allocation9], 1 }
 0x51b   :  { %1366 = vsyncpa [#allocation4], 1 }
 0x51c   :  { %1368 = vsyncpa [#allocation4 + $0x1], 1 }
 0x51d   :  { %1369 = vsyncpa [#allocation12], 1 }

</bundles_post_ra>
